<compile_context>
chip_gen: v6e
topology: v6e:2x2x1
jax: 0.10.0
libtpu: 0.0.40
codegen_flags: <defaults>
</compile_context>

<pallas_src>
import functools

import jax
import jax.numpy as jnp
from jax.experimental import pallas as pl
from jax.experimental.pallas import tpu as pltpu


# ----------------------------- fused Pallas kernel ---------------------------

def pointnet_kernel(dst_col_ref, src_col_ref, dst_row_ref,
                    x_ref, pos_ref,
                    nw1_ref, nb1_ref, nw2_ref, nb2_ref,
                    lwxi_ref, lwxj_ref, lwpos_ref, lb1_ref, lw2_ref, lb2_ref,
                    gw1_ref, gb1_ref, gw2_ref, gb2_ref,
                    hw1_ref, hb1_ref, hw2_ref, hb2_ref,
                    o_ref, *, num_layers):
    f32 = jnp.float32
    n_nodes = x_ref.shape[0]
    n_edges = dst_col_ref.shape[0]

    # --- one-hot gather / scatter matrices: built once, reused every layer ---
    iota_en = jax.lax.broadcasted_iota(jnp.int32, (n_edges, n_nodes), 1)
    g_dst = (iota_en == dst_col_ref[...]).astype(f32)   # (E,N): selects x_i  = x[dst]
    g_src = (iota_en == src_col_ref[...]).astype(f32)   # (E,N): selects x_j  = x[src]
    iota_ne = jax.lax.broadcasted_iota(jnp.int32, (n_nodes, n_edges), 0)
    s_dst = (iota_ne == dst_row_ref[...]).astype(f32)   # (N,E): scatter-add onto dst

    # pos_j = pos[src] is layer-invariant -> compute once
    pos_j = jnp.dot(g_src, pos_ref[...], preferred_element_type=f32)     # (E,3)

    # --- node_lin: Linear -> ReLU -> Linear ---
    h = jnp.dot(x_ref[...], nw1_ref[...], preferred_element_type=f32)
    h = jnp.maximum(h + nb1_ref[...], 0.0)
    x = jnp.dot(h, nw2_ref[...], preferred_element_type=f32) + nb2_ref[...]

    # --- PointConv layers (unrolled; x stays resident in VMEM) ---
    for l in range(num_layers):
        x_i = jnp.dot(g_dst, x, preferred_element_type=f32)             # (E,H)
        x_j = jnp.dot(g_src, x, preferred_element_type=f32)             # (E,H)

        # local_nn first Linear applied to the *virtual* concat [x_i, x_j, pos_j]
        h = (jnp.dot(x_i, lwxi_ref[l], preferred_element_type=f32)
             + jnp.dot(x_j, lwxj_ref[l], preferred_element_type=f32)
             + jnp.dot(pos_j, lwpos_ref[l], preferred_element_type=f32)
             + lb1_ref[l])
        h = jnp.maximum(h, 0.0)
        msg = jnp.dot(h, lw2_ref[l], preferred_element_type=f32) + lb2_ref[l]

        # aggr='add' scatter of per-edge messages onto target nodes
        agg = jnp.dot(s_dst, msg, preferred_element_type=f32)           # (N,H)

        # global_nn: Linear -> ReLU -> Linear, then the fused post-conv ReLU
        g = jnp.dot(agg, gw1_ref[l], preferred_element_type=f32)
        g = jnp.maximum(g + gb1_ref[l], 0.0)
        x = jnp.dot(g, gw2_ref[l], preferred_element_type=f32) + gb2_ref[l]
        x = jnp.maximum(x, 0.0)

    # --- head: lin1 -> ReLU -> lin2 ---
    h = jnp.dot(x, hw1_ref[...], preferred_element_type=f32)
    h = jnp.maximum(h + hb1_ref[...], 0.0)
    o_ref[...] = jnp.dot(h, hw2_ref[...], preferred_element_type=f32) + hb2_ref[...]


# ----------------------------- wrapper ---------------------------------------

_VMEM = pl.BlockSpec(memory_space=pltpu.MemorySpace.VMEM)


def pointnet_forward(params, x, pos, edge_index, num_layers):
    # TODO(synk): the x.dim()==1 Embedding branch of the module is not needed
    # for 2-D node features and is not implemented here.
    n_nodes = x.shape[0]
    hidden = params["global"][0][0].shape[0]
    out_ch = params["lin2"][0].shape[1]

    src = edge_index[0].astype(jnp.int32)   # j (source)
    dst = edge_index[1].astype(jnp.int32)   # i (target)
    dst_col = dst.reshape(-1, 1)
    src_col = src.reshape(-1, 1)
    dst_row = dst.reshape(1, -1)

    # Split local_nn's first weight ((2H+3,H)) into x_i / x_j / pos_j slices and
    # stack all per-layer weights along a leading layer axis (DMA'd once).
    lwxi = jnp.stack([params["local"][i][0][:hidden, :] for i in range(num_layers)])
    lwxj = jnp.stack([params["local"][i][0][hidden:2 * hidden, :] for i in range(num_layers)])
    lwpos = jnp.stack([params["local"][i][0][2 * hidden:, :] for i in range(num_layers)])
    lb1 = jnp.stack([params["local"][i][1] for i in range(num_layers)])
    lw2 = jnp.stack([params["local"][i][2] for i in range(num_layers)])
    lb2 = jnp.stack([params["local"][i][3] for i in range(num_layers)])
    gw1 = jnp.stack([params["global"][i][0] for i in range(num_layers)])
    gb1 = jnp.stack([params["global"][i][1] for i in range(num_layers)])
    gw2 = jnp.stack([params["global"][i][2] for i in range(num_layers)])
    gb2 = jnp.stack([params["global"][i][3] for i in range(num_layers)])

    kernel = functools.partial(pointnet_kernel, num_layers=num_layers)
    return pl.pallas_call(
        kernel,
        out_shape=jax.ShapeDtypeStruct((n_nodes, out_ch), jnp.float32),
        in_specs=[_VMEM] * 23,
        out_specs=_VMEM,
    )(dst_col, src_col, dst_row, x, pos,
      *params["node_lin"],
      lwxi, lwxj, lwpos, lb1, lw2, lb2,
      gw1, gb1, gw2, gb2,
      *params["lin1"], *params["lin2"])


# ----------------------------- parameters ------------------------------------

def xavier_uniform(key, fan_in, fan_out):
    bound = jnp.sqrt(6.0 / (fan_in + fan_out))
    return jax.random.uniform(key, (fan_in, fan_out), jnp.float32, -bound, bound)


def make_linear(key, fan_in, fan_out):
    # weight stored as (in, out); bias as (1, out) for in-kernel broadcast
    w = xavier_uniform(key, fan_in, fan_out)
    b = jnp.zeros((1, fan_out), jnp.float32)
    return w, b


def init_params(key, in_ch, hidden, out_ch, num_layers):
    keys = jax.random.split(key, 4 + 4 * num_layers)
    k = iter(keys)
    p = {}
    # node_lin: Linear(in, H), ReLU, Linear(H, H)
    p["node_lin"] = make_linear(next(k), in_ch, hidden) + make_linear(next(k), hidden, hidden)
    # local_nn[i]: Linear(2H+3, H), ReLU, Linear(H, H)
    # global_nn[i]: Linear(H, H), ReLU, Linear(H, H)
    p["local"], p["global"] = [], []
    for _ in range(num_layers):
        p["local"].append(make_linear(next(k), hidden * 2 + 3, hidden)
                          + make_linear(next(k), hidden, hidden))
        p["global"].append(make_linear(next(k), hidden, hidden)
                           + make_linear(next(k), hidden, hidden))
    # head: lin1(H, H//2), lin2(H//2, out)
    p["lin1"] = make_linear(next(k), hidden, hidden // 2)
    p["lin2"] = make_linear(next(k), hidden // 2, out_ch)
    return p


# ----------------------------- pure-JAX reference ----------------------------

def pointnet_reference(params, x, pos, edge_index, num_layers):
    def lin(x, w, b):
        return x @ w + b

    n_nodes = x.shape[0]
    src, dst = edge_index[0], edge_index[1]
    w1, b1, w2, b2 = params["node_lin"]
    x = lin(jnp.maximum(lin(x, w1, b1), 0.0), w2, b2)
    for i in range(num_layers):
        temp = jnp.concatenate([x[dst], x[src], pos[src]], axis=-1)
        lw1, lb1, lw2, lb2 = params["local"][i]
        msg = lin(jnp.maximum(lin(temp, lw1, lb1), 0.0), lw2, lb2)
        agg = jnp.zeros((n_nodes, msg.shape[1]), jnp.float32).at[dst].add(msg)
        gw1, gb1, gw2, gb2 = params["global"][i]
        x = lin(jnp.maximum(lin(agg, gw1, gb1), 0.0), gw2, gb2)
        x = jnp.maximum(x, 0.0)
    w1, b1 = params["lin1"]
    w2, b2 = params["lin2"]
    return lin(jnp.maximum(lin(x, w1, b1), 0.0), w2, b2)


# ----------------------------- main -------------------------------------------

if __name__ == "__main__":
    num_nodes = 16
    num_edges = 32
    input_channels_node = 4
    hidden_channels = 32
    output_channels = 8
    num_layers = 3

    key = jax.random.PRNGKey(0)
    k_param, k_x, k_pos, k_src, k_dst = jax.random.split(key, 5)

    params = init_params(k_param, input_channels_node, hidden_channels,
                         output_channels, num_layers)

    x = jax.random.normal(k_x, (num_nodes, input_channels_node), jnp.float32)
    pos = jax.random.normal(k_pos, (num_nodes, 3), jnp.float32)
    edge_index = jnp.stack([
        jax.random.randint(k_src, (num_edges,), 0, num_nodes, jnp.int32),
        jax.random.randint(k_dst, (num_edges,), 0, num_nodes, jnp.int32),
    ], axis=0)
    batch = jnp.zeros((num_nodes,), jnp.int32)  # unused by forward (signature parity)

    fwd = jax.jit(functools.partial(pointnet_forward, num_layers=num_layers))
    out = fwd(params, x, pos, edge_index)
    out = jax.block_until_ready(out)

    ref = pointnet_reference(params, x, pos, edge_index, num_layers)
    assert out.shape == (num_nodes, output_channels)
    assert jnp.allclose(out, ref, atol=1e-4, rtol=1e-4)

    print("KERNEL_OK")
</pallas_src>

<mosaic_0001>
module attributes {stable_mosaic.version = 11 : i64} {
  func.func @pointnet_kernel(%arg0: memref<32x1xi32, #tpu.memory_space<vmem>>, %arg1: memref<32x1xi32, #tpu.memory_space<vmem>>, %arg2: memref<1x32xi32, #tpu.memory_space<vmem>>, %arg3: memref<16x4xf32, #tpu.memory_space<vmem>>, %arg4: memref<16x3xf32, #tpu.memory_space<vmem>>, %arg5: memref<4x32xf32, #tpu.memory_space<vmem>>, %arg6: memref<1x32xf32, #tpu.memory_space<vmem>>, %arg7: memref<32x32xf32, #tpu.memory_space<vmem>>, %arg8: memref<1x32xf32, #tpu.memory_space<vmem>>, %arg9: memref<3x32x32xf32, #tpu.memory_space<vmem>>, %arg10: memref<3x32x32xf32, #tpu.memory_space<vmem>>, %arg11: memref<3x3x32xf32, #tpu.memory_space<vmem>>, %arg12: memref<3x1x32xf32, #tpu.memory_space<vmem>>, %arg13: memref<3x32x32xf32, #tpu.memory_space<vmem>>, %arg14: memref<3x1x32xf32, #tpu.memory_space<vmem>>, %arg15: memref<3x32x32xf32, #tpu.memory_space<vmem>>, %arg16: memref<3x1x32xf32, #tpu.memory_space<vmem>>, %arg17: memref<3x32x32xf32, #tpu.memory_space<vmem>>, %arg18: memref<3x1x32xf32, #tpu.memory_space<vmem>>, %arg19: memref<32x16xf32, #tpu.memory_space<vmem>>, %arg20: memref<1x16xf32, #tpu.memory_space<vmem>>, %arg21: memref<16x8xf32, #tpu.memory_space<vmem>>, %arg22: memref<1x8xf32, #tpu.memory_space<vmem>>, %arg23: memref<16x8xf32, #tpu.memory_space<vmem>>) attributes {dimension_semantics = [], scalar_prefetch = 0 : i64, scratch_operands = 0 : i64, tpu.core_type = #tpu.core_type<tc>} {
    %0 = tpu.iota {dimensions = array<i32: 1>} : vector<32x16xi32>
    %c0 = arith.constant 0 : index
    %c0_0 = arith.constant 0 : index
    %1 = vector.load %arg0[%c0, %c0_0] : memref<32x1xi32, #tpu.memory_space<vmem>>, vector<32x1xi32>
    %2 = vector.broadcast %1 : vector<32x1xi32> to vector<32x16xi32>
    %3 = arith.cmpi eq, %0, %2 : vector<32x16xi32>
    %4 = arith.extui %3 : vector<32x16xi1> to vector<32x16xi32>
    %5 = arith.sitofp %4 : vector<32x16xi32> to vector<32x16xf32>
    %c0_1 = arith.constant 0 : index
    %c0_2 = arith.constant 0 : index
    %6 = vector.load %arg1[%c0_1, %c0_2] : memref<32x1xi32, #tpu.memory_space<vmem>>, vector<32x1xi32>
    %7 = vector.broadcast %6 : vector<32x1xi32> to vector<32x16xi32>
    %8 = arith.cmpi eq, %0, %7 : vector<32x16xi32>
    %9 = arith.extui %8 : vector<32x16xi1> to vector<32x16xi32>
    %10 = arith.sitofp %9 : vector<32x16xi32> to vector<32x16xf32>
    %11 = tpu.iota {dimensions = array<i32: 0>} : vector<16x32xi32>
    %c0_3 = arith.constant 0 : index
    %c0_4 = arith.constant 0 : index
    %12 = vector.load %arg2[%c0_3, %c0_4] : memref<1x32xi32, #tpu.memory_space<vmem>>, vector<1x32xi32>
    %13 = vector.broadcast %12 : vector<1x32xi32> to vector<16x32xi32>
    %14 = arith.cmpi eq, %11, %13 : vector<16x32xi32>
    %15 = arith.extui %14 : vector<16x32xi1> to vector<16x32xi32>
    %16 = arith.sitofp %15 : vector<16x32xi32> to vector<16x32xf32>
    %c0_5 = arith.constant 0 : index
    %c0_6 = arith.constant 0 : index
    %17 = vector.load %arg4[%c0_5, %c0_6] : memref<16x3xf32, #tpu.memory_space<vmem>>, vector<16x3xf32>
    %cst = arith.constant dense<0.000000e+00> : vector<32x3xf32>
    %18 = tpu.matmul %10, %17, %cst {dimension_numbers = #tpu.dot_dimension_numbers<[1], [0], [0], [1], [0, 0, 1, 1], [], []>} : vector<32x16xf32>, vector<16x3xf32>, vector<32x3xf32> -> vector<32x3xf32>
    %c0_7 = arith.constant 0 : index
    %c0_8 = arith.constant 0 : index
    %19 = vector.load %arg3[%c0_7, %c0_8] : memref<16x4xf32, #tpu.memory_space<vmem>>, vector<16x4xf32>
    %c0_9 = arith.constant 0 : index
    %c0_10 = arith.constant 0 : index
    %20 = vector.load %arg5[%c0_9, %c0_10] : memref<4x32xf32, #tpu.memory_space<vmem>>, vector<4x32xf32>
    %cst_11 = arith.constant dense<0.000000e+00> : vector<16x32xf32>
    %21 = tpu.matmul %19, %20, %cst_11 {dimension_numbers = #tpu.dot_dimension_numbers<[1], [0], [0], [1], [0, 0, 1, 1], [], []>} : vector<16x4xf32>, vector<4x32xf32>, vector<16x32xf32> -> vector<16x32xf32>
    %c0_12 = arith.constant 0 : index
    %c0_13 = arith.constant 0 : index
    %22 = vector.load %arg6[%c0_12, %c0_13] : memref<1x32xf32, #tpu.memory_space<vmem>>, vector<1x32xf32>
    %23 = vector.broadcast %22 : vector<1x32xf32> to vector<16x32xf32>
    %24 = arith.addf %21, %23 : vector<16x32xf32>
    %cst_14 = arith.constant 0.000000e+00 : f32
    %25 = vector.broadcast %cst_14 : f32 to vector<16x32xf32>
    %26 = arith.maximumf %24, %25 : vector<16x32xf32>
    %c0_15 = arith.constant 0 : index
    %c0_16 = arith.constant 0 : index
    %27 = vector.load %arg7[%c0_15, %c0_16] : memref<32x32xf32, #tpu.memory_space<vmem>>, vector<32x32xf32>
    %cst_17 = arith.constant dense<0.000000e+00> : vector<16x32xf32>
    %28 = tpu.matmul %26, %27, %cst_17 {dimension_numbers = #tpu.dot_dimension_numbers<[1], [0], [0], [1], [0, 0, 1, 1], [], []>} : vector<16x32xf32>, vector<32x32xf32>, vector<16x32xf32> -> vector<16x32xf32>
    %c0_18 = arith.constant 0 : index
    %c0_19 = arith.constant 0 : index
    %29 = vector.load %arg8[%c0_18, %c0_19] : memref<1x32xf32, #tpu.memory_space<vmem>>, vector<1x32xf32>
    %30 = vector.broadcast %29 : vector<1x32xf32> to vector<16x32xf32>
    %31 = arith.addf %28, %30 : vector<16x32xf32>
    %cst_20 = arith.constant dense<0.000000e+00> : vector<32x32xf32>
    %32 = tpu.matmul %5, %31, %cst_20 {dimension_numbers = #tpu.dot_dimension_numbers<[1], [0], [0], [1], [0, 0, 1, 1], [], []>} : vector<32x16xf32>, vector<16x32xf32>, vector<32x32xf32> -> vector<32x32xf32>
    %cst_21 = arith.constant dense<0.000000e+00> : vector<32x32xf32>
    %33 = tpu.matmul %10, %31, %cst_21 {dimension_numbers = #tpu.dot_dimension_numbers<[1], [0], [0], [1], [0, 0, 1, 1], [], []>} : vector<32x16xf32>, vector<16x32xf32>, vector<32x32xf32> -> vector<32x32xf32>
    %c0_22 = arith.constant 0 : index
    %c0_23 = arith.constant 0 : index
    %c0_24 = arith.constant 0 : index
    %34 = vector.load %arg9[%c0_22, %c0_23, %c0_24] : memref<3x32x32xf32, #tpu.memory_space<vmem>>, vector<1x32x32xf32>
    %35 = vector.shape_cast %34 : vector<1x32x32xf32> to vector<32x32xf32>
    %cst_25 = arith.constant dense<0.000000e+00> : vector<32x32xf32>
    %36 = tpu.matmul %32, %35, %cst_25 {dimension_numbers = #tpu.dot_dimension_numbers<[1], [0], [0], [1], [0, 0, 1, 1], [], []>} : vector<32x32xf32>, vector<32x32xf32>, vector<32x32xf32> -> vector<32x32xf32>
    %c0_26 = arith.constant 0 : index
    %c0_27 = arith.constant 0 : index
    %c0_28 = arith.constant 0 : index
    %37 = vector.load %arg10[%c0_26, %c0_27, %c0_28] : memref<3x32x32xf32, #tpu.memory_space<vmem>>, vector<1x32x32xf32>
    %38 = vector.shape_cast %37 : vector<1x32x32xf32> to vector<32x32xf32>
    %cst_29 = arith.constant dense<0.000000e+00> : vector<32x32xf32>
    %39 = tpu.matmul %33, %38, %cst_29 {dimension_numbers = #tpu.dot_dimension_numbers<[1], [0], [0], [1], [0, 0, 1, 1], [], []>} : vector<32x32xf32>, vector<32x32xf32>, vector<32x32xf32> -> vector<32x32xf32>
    %40 = arith.addf %36, %39 : vector<32x32xf32>
    %c0_30 = arith.constant 0 : index
    %c0_31 = arith.constant 0 : index
    %c0_32 = arith.constant 0 : index
    %41 = vector.load %arg11[%c0_30, %c0_31, %c0_32] : memref<3x3x32xf32, #tpu.memory_space<vmem>>, vector<1x3x32xf32>
    %42 = vector.shape_cast %41 : vector<1x3x32xf32> to vector<3x32xf32>
    %cst_33 = arith.constant dense<0.000000e+00> : vector<32x32xf32>
    %43 = tpu.matmul %18, %42, %cst_33 {dimension_numbers = #tpu.dot_dimension_numbers<[1], [0], [0], [1], [0, 0, 1, 1], [], []>} : vector<32x3xf32>, vector<3x32xf32>, vector<32x32xf32> -> vector<32x32xf32>
    %44 = arith.addf %40, %43 : vector<32x32xf32>
    %c0_34 = arith.constant 0 : index
    %c0_35 = arith.constant 0 : index
    %c0_36 = arith.constant 0 : index
    %45 = vector.load %arg12[%c0_34, %c0_35, %c0_36] : memref<3x1x32xf32, #tpu.memory_space<vmem>>, vector<1x1x32xf32>
    %46 = vector.shape_cast %45 : vector<1x1x32xf32> to vector<1x32xf32>
    %47 = vector.broadcast %46 : vector<1x32xf32> to vector<32x32xf32>
    %48 = arith.addf %44, %47 : vector<32x32xf32>
    %cst_37 = arith.constant 0.000000e+00 : f32
    %49 = vector.broadcast %cst_37 : f32 to vector<32x32xf32>
    %50 = arith.maximumf %48, %49 : vector<32x32xf32>
    %c0_38 = arith.constant 0 : index
    %c0_39 = arith.constant 0 : index
    %c0_40 = arith.constant 0 : index
    %51 = vector.load %arg13[%c0_38, %c0_39, %c0_40] : memref<3x32x32xf32, #tpu.memory_space<vmem>>, vector<1x32x32xf32>
    %52 = vector.shape_cast %51 : vector<1x32x32xf32> to vector<32x32xf32>
    %cst_41 = arith.constant dense<0.000000e+00> : vector<32x32xf32>
    %53 = tpu.matmul %50, %52, %cst_41 {dimension_numbers = #tpu.dot_dimension_numbers<[1], [0], [0], [1], [0, 0, 1, 1], [], []>} : vector<32x32xf32>, vector<32x32xf32>, vector<32x32xf32> -> vector<32x32xf32>
    %c0_42 = arith.constant 0 : index
    %c0_43 = arith.constant 0 : index
    %c0_44 = arith.constant 0 : index
    %54 = vector.load %arg14[%c0_42, %c0_43, %c0_44] : memref<3x1x32xf32, #tpu.memory_space<vmem>>, vector<1x1x32xf32>
    %55 = vector.shape_cast %54 : vector<1x1x32xf32> to vector<1x32xf32>
    %56 = vector.broadcast %55 : vector<1x32xf32> to vector<32x32xf32>
    %57 = arith.addf %53, %56 : vector<32x32xf32>
    %cst_45 = arith.constant dense<0.000000e+00> : vector<16x32xf32>
    %58 = tpu.matmul %16, %57, %cst_45 {dimension_numbers = #tpu.dot_dimension_numbers<[1], [0], [0], [1], [0, 0, 1, 1], [], []>} : vector<16x32xf32>, vector<32x32xf32>, vector<16x32xf32> -> vector<16x32xf32>
    %c0_46 = arith.constant 0 : index
    %c0_47 = arith.constant 0 : index
    %c0_48 = arith.constant 0 : index
    %59 = vector.load %arg15[%c0_46, %c0_47, %c0_48] : memref<3x32x32xf32, #tpu.memory_space<vmem>>, vector<1x32x32xf32>
    %60 = vector.shape_cast %59 : vector<1x32x32xf32> to vector<32x32xf32>
    %cst_49 = arith.constant dense<0.000000e+00> : vector<16x32xf32>
    %61 = tpu.matmul %58, %60, %cst_49 {dimension_numbers = #tpu.dot_dimension_numbers<[1], [0], [0], [1], [0, 0, 1, 1], [], []>} : vector<16x32xf32>, vector<32x32xf32>, vector<16x32xf32> -> vector<16x32xf32>
    %c0_50 = arith.constant 0 : index
    %c0_51 = arith.constant 0 : index
    %c0_52 = arith.constant 0 : index
    %62 = vector.load %arg16[%c0_50, %c0_51, %c0_52] : memref<3x1x32xf32, #tpu.memory_space<vmem>>, vector<1x1x32xf32>
    %63 = vector.shape_cast %62 : vector<1x1x32xf32> to vector<1x32xf32>
    %64 = vector.broadcast %63 : vector<1x32xf32> to vector<16x32xf32>
    %65 = arith.addf %61, %64 : vector<16x32xf32>
    %cst_53 = arith.constant 0.000000e+00 : f32
    %66 = vector.broadcast %cst_53 : f32 to vector<16x32xf32>
    %67 = arith.maximumf %65, %66 : vector<16x32xf32>
    %c0_54 = arith.constant 0 : index
    %c0_55 = arith.constant 0 : index
    %c0_56 = arith.constant 0 : index
    %68 = vector.load %arg17[%c0_54, %c0_55, %c0_56] : memref<3x32x32xf32, #tpu.memory_space<vmem>>, vector<1x32x32xf32>
    %69 = vector.shape_cast %68 : vector<1x32x32xf32> to vector<32x32xf32>
    %cst_57 = arith.constant dense<0.000000e+00> : vector<16x32xf32>
    %70 = tpu.matmul %67, %69, %cst_57 {dimension_numbers = #tpu.dot_dimension_numbers<[1], [0], [0], [1], [0, 0, 1, 1], [], []>} : vector<16x32xf32>, vector<32x32xf32>, vector<16x32xf32> -> vector<16x32xf32>
    %c0_58 = arith.constant 0 : index
    %c0_59 = arith.constant 0 : index
    %c0_60 = arith.constant 0 : index
    %71 = vector.load %arg18[%c0_58, %c0_59, %c0_60] : memref<3x1x32xf32, #tpu.memory_space<vmem>>, vector<1x1x32xf32>
    %72 = vector.shape_cast %71 : vector<1x1x32xf32> to vector<1x32xf32>
    %73 = vector.broadcast %72 : vector<1x32xf32> to vector<16x32xf32>
    %74 = arith.addf %70, %73 : vector<16x32xf32>
    %cst_61 = arith.constant 0.000000e+00 : f32
    %75 = vector.broadcast %cst_61 : f32 to vector<16x32xf32>
    %76 = arith.maximumf %74, %75 : vector<16x32xf32>
    %cst_62 = arith.constant dense<0.000000e+00> : vector<32x32xf32>
    %77 = tpu.matmul %5, %76, %cst_62 {dimension_numbers = #tpu.dot_dimension_numbers<[1], [0], [0], [1], [0, 0, 1, 1], [], []>} : vector<32x16xf32>, vector<16x32xf32>, vector<32x32xf32> -> vector<32x32xf32>
    %cst_63 = arith.constant dense<0.000000e+00> : vector<32x32xf32>
    %78 = tpu.matmul %10, %76, %cst_63 {dimension_numbers = #tpu.dot_dimension_numbers<[1], [0], [0], [1], [0, 0, 1, 1], [], []>} : vector<32x16xf32>, vector<16x32xf32>, vector<32x32xf32> -> vector<32x32xf32>
    %c1 = arith.constant 1 : index
    %c0_64 = arith.constant 0 : index
    %c0_65 = arith.constant 0 : index
    %79 = vector.load %arg9[%c1, %c0_64, %c0_65] : memref<3x32x32xf32, #tpu.memory_space<vmem>>, vector<1x32x32xf32>
    %80 = vector.shape_cast %79 : vector<1x32x32xf32> to vector<32x32xf32>
    %cst_66 = arith.constant dense<0.000000e+00> : vector<32x32xf32>
    %81 = tpu.matmul %77, %80, %cst_66 {dimension_numbers = #tpu.dot_dimension_numbers<[1], [0], [0], [1], [0, 0, 1, 1], [], []>} : vector<32x32xf32>, vector<32x32xf32>, vector<32x32xf32> -> vector<32x32xf32>
    %c1_67 = arith.constant 1 : index
    %c0_68 = arith.constant 0 : index
    %c0_69 = arith.constant 0 : index
    %82 = vector.load %arg10[%c1_67, %c0_68, %c0_69] : memref<3x32x32xf32, #tpu.memory_space<vmem>>, vector<1x32x32xf32>
    %83 = vector.shape_cast %82 : vector<1x32x32xf32> to vector<32x32xf32>
    %cst_70 = arith.constant dense<0.000000e+00> : vector<32x32xf32>
    %84 = tpu.matmul %78, %83, %cst_70 {dimension_numbers = #tpu.dot_dimension_numbers<[1], [0], [0], [1], [0, 0, 1, 1], [], []>} : vector<32x32xf32>, vector<32x32xf32>, vector<32x32xf32> -> vector<32x32xf32>
    %85 = arith.addf %81, %84 : vector<32x32xf32>
    %c1_71 = arith.constant 1 : index
    %c0_72 = arith.constant 0 : index
    %c0_73 = arith.constant 0 : index
    %86 = vector.load %arg11[%c1_71, %c0_72, %c0_73] : memref<3x3x32xf32, #tpu.memory_space<vmem>>, vector<1x3x32xf32>
    %87 = vector.shape_cast %86 : vector<1x3x32xf32> to vector<3x32xf32>
    %cst_74 = arith.constant dense<0.000000e+00> : vector<32x32xf32>
    %88 = tpu.matmul %18, %87, %cst_74 {dimension_numbers = #tpu.dot_dimension_numbers<[1], [0], [0], [1], [0, 0, 1, 1], [], []>} : vector<32x3xf32>, vector<3x32xf32>, vector<32x32xf32> -> vector<32x32xf32>
    %89 = arith.addf %85, %88 : vector<32x32xf32>
    %c1_75 = arith.constant 1 : index
    %c0_76 = arith.constant 0 : index
    %c0_77 = arith.constant 0 : index
    %90 = vector.load %arg12[%c1_75, %c0_76, %c0_77] : memref<3x1x32xf32, #tpu.memory_space<vmem>>, vector<1x1x32xf32>
    %91 = vector.shape_cast %90 : vector<1x1x32xf32> to vector<1x32xf32>
    %92 = vector.broadcast %91 : vector<1x32xf32> to vector<32x32xf32>
    %93 = arith.addf %89, %92 : vector<32x32xf32>
    %cst_78 = arith.constant 0.000000e+00 : f32
    %94 = vector.broadcast %cst_78 : f32 to vector<32x32xf32>
    %95 = arith.maximumf %93, %94 : vector<32x32xf32>
    %c1_79 = arith.constant 1 : index
    %c0_80 = arith.constant 0 : index
    %c0_81 = arith.constant 0 : index
    %96 = vector.load %arg13[%c1_79, %c0_80, %c0_81] : memref<3x32x32xf32, #tpu.memory_space<vmem>>, vector<1x32x32xf32>
    %97 = vector.shape_cast %96 : vector<1x32x32xf32> to vector<32x32xf32>
    %cst_82 = arith.constant dense<0.000000e+00> : vector<32x32xf32>
    %98 = tpu.matmul %95, %97, %cst_82 {dimension_numbers = #tpu.dot_dimension_numbers<[1], [0], [0], [1], [0, 0, 1, 1], [], []>} : vector<32x32xf32>, vector<32x32xf32>, vector<32x32xf32> -> vector<32x32xf32>
    %c1_83 = arith.constant 1 : index
    %c0_84 = arith.constant 0 : index
    %c0_85 = arith.constant 0 : index
    %99 = vector.load %arg14[%c1_83, %c0_84, %c0_85] : memref<3x1x32xf32, #tpu.memory_space<vmem>>, vector<1x1x32xf32>
    %100 = vector.shape_cast %99 : vector<1x1x32xf32> to vector<1x32xf32>
    %101 = vector.broadcast %100 : vector<1x32xf32> to vector<32x32xf32>
    %102 = arith.addf %98, %101 : vector<32x32xf32>
    %cst_86 = arith.constant dense<0.000000e+00> : vector<16x32xf32>
    %103 = tpu.matmul %16, %102, %cst_86 {dimension_numbers = #tpu.dot_dimension_numbers<[1], [0], [0], [1], [0, 0, 1, 1], [], []>} : vector<16x32xf32>, vector<32x32xf32>, vector<16x32xf32> -> vector<16x32xf32>
    %c1_87 = arith.constant 1 : index
    %c0_88 = arith.constant 0 : index
    %c0_89 = arith.constant 0 : index
    %104 = vector.load %arg15[%c1_87, %c0_88, %c0_89] : memref<3x32x32xf32, #tpu.memory_space<vmem>>, vector<1x32x32xf32>
    %105 = vector.shape_cast %104 : vector<1x32x32xf32> to vector<32x32xf32>
    %cst_90 = arith.constant dense<0.000000e+00> : vector<16x32xf32>
    %106 = tpu.matmul %103, %105, %cst_90 {dimension_numbers = #tpu.dot_dimension_numbers<[1], [0], [0], [1], [0, 0, 1, 1], [], []>} : vector<16x32xf32>, vector<32x32xf32>, vector<16x32xf32> -> vector<16x32xf32>
    %c1_91 = arith.constant 1 : index
    %c0_92 = arith.constant 0 : index
    %c0_93 = arith.constant 0 : index
    %107 = vector.load %arg16[%c1_91, %c0_92, %c0_93] : memref<3x1x32xf32, #tpu.memory_space<vmem>>, vector<1x1x32xf32>
    %108 = vector.shape_cast %107 : vector<1x1x32xf32> to vector<1x32xf32>
    %109 = vector.broadcast %108 : vector<1x32xf32> to vector<16x32xf32>
    %110 = arith.addf %106, %109 : vector<16x32xf32>
    %cst_94 = arith.constant 0.000000e+00 : f32
    %111 = vector.broadcast %cst_94 : f32 to vector<16x32xf32>
    %112 = arith.maximumf %110, %111 : vector<16x32xf32>
    %c1_95 = arith.constant 1 : index
    %c0_96 = arith.constant 0 : index
    %c0_97 = arith.constant 0 : index
    %113 = vector.load %arg17[%c1_95, %c0_96, %c0_97] : memref<3x32x32xf32, #tpu.memory_space<vmem>>, vector<1x32x32xf32>
    %114 = vector.shape_cast %113 : vector<1x32x32xf32> to vector<32x32xf32>
    %cst_98 = arith.constant dense<0.000000e+00> : vector<16x32xf32>
    %115 = tpu.matmul %112, %114, %cst_98 {dimension_numbers = #tpu.dot_dimension_numbers<[1], [0], [0], [1], [0, 0, 1, 1], [], []>} : vector<16x32xf32>, vector<32x32xf32>, vector<16x32xf32> -> vector<16x32xf32>
    %c1_99 = arith.constant 1 : index
    %c0_100 = arith.constant 0 : index
    %c0_101 = arith.constant 0 : index
    %116 = vector.load %arg18[%c1_99, %c0_100, %c0_101] : memref<3x1x32xf32, #tpu.memory_space<vmem>>, vector<1x1x32xf32>
    %117 = vector.shape_cast %116 : vector<1x1x32xf32> to vector<1x32xf32>
    %118 = vector.broadcast %117 : vector<1x32xf32> to vector<16x32xf32>
    %119 = arith.addf %115, %118 : vector<16x32xf32>
    %cst_102 = arith.constant 0.000000e+00 : f32
    %120 = vector.broadcast %cst_102 : f32 to vector<16x32xf32>
    %121 = arith.maximumf %119, %120 : vector<16x32xf32>
    %cst_103 = arith.constant dense<0.000000e+00> : vector<32x32xf32>
    %122 = tpu.matmul %5, %121, %cst_103 {dimension_numbers = #tpu.dot_dimension_numbers<[1], [0], [0], [1], [0, 0, 1, 1], [], []>} : vector<32x16xf32>, vector<16x32xf32>, vector<32x32xf32> -> vector<32x32xf32>
    %cst_104 = arith.constant dense<0.000000e+00> : vector<32x32xf32>
    %123 = tpu.matmul %10, %121, %cst_104 {dimension_numbers = #tpu.dot_dimension_numbers<[1], [0], [0], [1], [0, 0, 1, 1], [], []>} : vector<32x16xf32>, vector<16x32xf32>, vector<32x32xf32> -> vector<32x32xf32>
    %c2 = arith.constant 2 : index
    %c0_105 = arith.constant 0 : index
    %c0_106 = arith.constant 0 : index
    %124 = vector.load %arg9[%c2, %c0_105, %c0_106] : memref<3x32x32xf32, #tpu.memory_space<vmem>>, vector<1x32x32xf32>
    %125 = vector.shape_cast %124 : vector<1x32x32xf32> to vector<32x32xf32>
    %cst_107 = arith.constant dense<0.000000e+00> : vector<32x32xf32>
    %126 = tpu.matmul %122, %125, %cst_107 {dimension_numbers = #tpu.dot_dimension_numbers<[1], [0], [0], [1], [0, 0, 1, 1], [], []>} : vector<32x32xf32>, vector<32x32xf32>, vector<32x32xf32> -> vector<32x32xf32>
    %c2_108 = arith.constant 2 : index
    %c0_109 = arith.constant 0 : index
    %c0_110 = arith.constant 0 : index
    %127 = vector.load %arg10[%c2_108, %c0_109, %c0_110] : memref<3x32x32xf32, #tpu.memory_space<vmem>>, vector<1x32x32xf32>
    %128 = vector.shape_cast %127 : vector<1x32x32xf32> to vector<32x32xf32>
    %cst_111 = arith.constant dense<0.000000e+00> : vector<32x32xf32>
    %129 = tpu.matmul %123, %128, %cst_111 {dimension_numbers = #tpu.dot_dimension_numbers<[1], [0], [0], [1], [0, 0, 1, 1], [], []>} : vector<32x32xf32>, vector<32x32xf32>, vector<32x32xf32> -> vector<32x32xf32>
    %130 = arith.addf %126, %129 : vector<32x32xf32>
    %c2_112 = arith.constant 2 : index
    %c0_113 = arith.constant 0 : index
    %c0_114 = arith.constant 0 : index
    %131 = vector.load %arg11[%c2_112, %c0_113, %c0_114] : memref<3x3x32xf32, #tpu.memory_space<vmem>>, vector<1x3x32xf32>
    %132 = vector.shape_cast %131 : vector<1x3x32xf32> to vector<3x32xf32>
    %cst_115 = arith.constant dense<0.000000e+00> : vector<32x32xf32>
    %133 = tpu.matmul %18, %132, %cst_115 {dimension_numbers = #tpu.dot_dimension_numbers<[1], [0], [0], [1], [0, 0, 1, 1], [], []>} : vector<32x3xf32>, vector<3x32xf32>, vector<32x32xf32> -> vector<32x32xf32>
    %134 = arith.addf %130, %133 : vector<32x32xf32>
    %c2_116 = arith.constant 2 : index
    %c0_117 = arith.constant 0 : index
    %c0_118 = arith.constant 0 : index
    %135 = vector.load %arg12[%c2_116, %c0_117, %c0_118] : memref<3x1x32xf32, #tpu.memory_space<vmem>>, vector<1x1x32xf32>
    %136 = vector.shape_cast %135 : vector<1x1x32xf32> to vector<1x32xf32>
    %137 = vector.broadcast %136 : vector<1x32xf32> to vector<32x32xf32>
    %138 = arith.addf %134, %137 : vector<32x32xf32>
    %cst_119 = arith.constant 0.000000e+00 : f32
    %139 = vector.broadcast %cst_119 : f32 to vector<32x32xf32>
    %140 = arith.maximumf %138, %139 : vector<32x32xf32>
    %c2_120 = arith.constant 2 : index
    %c0_121 = arith.constant 0 : index
    %c0_122 = arith.constant 0 : index
    %141 = vector.load %arg13[%c2_120, %c0_121, %c0_122] : memref<3x32x32xf32, #tpu.memory_space<vmem>>, vector<1x32x32xf32>
    %142 = vector.shape_cast %141 : vector<1x32x32xf32> to vector<32x32xf32>
    %cst_123 = arith.constant dense<0.000000e+00> : vector<32x32xf32>
    %143 = tpu.matmul %140, %142, %cst_123 {dimension_numbers = #tpu.dot_dimension_numbers<[1], [0], [0], [1], [0, 0, 1, 1], [], []>} : vector<32x32xf32>, vector<32x32xf32>, vector<32x32xf32> -> vector<32x32xf32>
    %c2_124 = arith.constant 2 : index
    %c0_125 = arith.constant 0 : index
    %c0_126 = arith.constant 0 : index
    %144 = vector.load %arg14[%c2_124, %c0_125, %c0_126] : memref<3x1x32xf32, #tpu.memory_space<vmem>>, vector<1x1x32xf32>
    %145 = vector.shape_cast %144 : vector<1x1x32xf32> to vector<1x32xf32>
    %146 = vector.broadcast %145 : vector<1x32xf32> to vector<32x32xf32>
    %147 = arith.addf %143, %146 : vector<32x32xf32>
    %cst_127 = arith.constant dense<0.000000e+00> : vector<16x32xf32>
    %148 = tpu.matmul %16, %147, %cst_127 {dimension_numbers = #tpu.dot_dimension_numbers<[1], [0], [0], [1], [0, 0, 1, 1], [], []>} : vector<16x32xf32>, vector<32x32xf32>, vector<16x32xf32> -> vector<16x32xf32>
    %c2_128 = arith.constant 2 : index
    %c0_129 = arith.constant 0 : index
    %c0_130 = arith.constant 0 : index
    %149 = vector.load %arg15[%c2_128, %c0_129, %c0_130] : memref<3x32x32xf32, #tpu.memory_space<vmem>>, vector<1x32x32xf32>
    %150 = vector.shape_cast %149 : vector<1x32x32xf32> to vector<32x32xf32>
    %cst_131 = arith.constant dense<0.000000e+00> : vector<16x32xf32>
    %151 = tpu.matmul %148, %150, %cst_131 {dimension_numbers = #tpu.dot_dimension_numbers<[1], [0], [0], [1], [0, 0, 1, 1], [], []>} : vector<16x32xf32>, vector<32x32xf32>, vector<16x32xf32> -> vector<16x32xf32>
    %c2_132 = arith.constant 2 : index
    %c0_133 = arith.constant 0 : index
    %c0_134 = arith.constant 0 : index
    %152 = vector.load %arg16[%c2_132, %c0_133, %c0_134] : memref<3x1x32xf32, #tpu.memory_space<vmem>>, vector<1x1x32xf32>
    %153 = vector.shape_cast %152 : vector<1x1x32xf32> to vector<1x32xf32>
    %154 = vector.broadcast %153 : vector<1x32xf32> to vector<16x32xf32>
    %155 = arith.addf %151, %154 : vector<16x32xf32>
    %cst_135 = arith.constant 0.000000e+00 : f32
    %156 = vector.broadcast %cst_135 : f32 to vector<16x32xf32>
    %157 = arith.maximumf %155, %156 : vector<16x32xf32>
    %c2_136 = arith.constant 2 : index
    %c0_137 = arith.constant 0 : index
    %c0_138 = arith.constant 0 : index
    %158 = vector.load %arg17[%c2_136, %c0_137, %c0_138] : memref<3x32x32xf32, #tpu.memory_space<vmem>>, vector<1x32x32xf32>
    %159 = vector.shape_cast %158 : vector<1x32x32xf32> to vector<32x32xf32>
    %cst_139 = arith.constant dense<0.000000e+00> : vector<16x32xf32>
    %160 = tpu.matmul %157, %159, %cst_139 {dimension_numbers = #tpu.dot_dimension_numbers<[1], [0], [0], [1], [0, 0, 1, 1], [], []>} : vector<16x32xf32>, vector<32x32xf32>, vector<16x32xf32> -> vector<16x32xf32>
    %c2_140 = arith.constant 2 : index
    %c0_141 = arith.constant 0 : index
    %c0_142 = arith.constant 0 : index
    %161 = vector.load %arg18[%c2_140, %c0_141, %c0_142] : memref<3x1x32xf32, #tpu.memory_space<vmem>>, vector<1x1x32xf32>
    %162 = vector.shape_cast %161 : vector<1x1x32xf32> to vector<1x32xf32>
    %163 = vector.broadcast %162 : vector<1x32xf32> to vector<16x32xf32>
    %164 = arith.addf %160, %163 : vector<16x32xf32>
    %cst_143 = arith.constant 0.000000e+00 : f32
    %165 = vector.broadcast %cst_143 : f32 to vector<16x32xf32>
    %166 = arith.maximumf %164, %165 : vector<16x32xf32>
    %c0_144 = arith.constant 0 : index
    %c0_145 = arith.constant 0 : index
    %167 = vector.load %arg19[%c0_144, %c0_145] : memref<32x16xf32, #tpu.memory_space<vmem>>, vector<32x16xf32>
    %cst_146 = arith.constant dense<0.000000e+00> : vector<16x16xf32>
    %168 = tpu.matmul %166, %167, %cst_146 {dimension_numbers = #tpu.dot_dimension_numbers<[1], [0], [0], [1], [0, 0, 1, 1], [], []>} : vector<16x32xf32>, vector<32x16xf32>, vector<16x16xf32> -> vector<16x16xf32>
    %c0_147 = arith.constant 0 : index
    %c0_148 = arith.constant 0 : index
    %169 = vector.load %arg20[%c0_147, %c0_148] : memref<1x16xf32, #tpu.memory_space<vmem>>, vector<1x16xf32>
    %170 = vector.broadcast %169 : vector<1x16xf32> to vector<16x16xf32>
    %171 = arith.addf %168, %170 : vector<16x16xf32>
    %cst_149 = arith.constant 0.000000e+00 : f32
    %172 = vector.broadcast %cst_149 : f32 to vector<16x16xf32>
    %173 = arith.maximumf %171, %172 : vector<16x16xf32>
    %c0_150 = arith.constant 0 : index
    %c0_151 = arith.constant 0 : index
    %174 = vector.load %arg21[%c0_150, %c0_151] : memref<16x8xf32, #tpu.memory_space<vmem>>, vector<16x8xf32>
    %cst_152 = arith.constant dense<0.000000e+00> : vector<16x8xf32>
    %175 = tpu.matmul %173, %174, %cst_152 {dimension_numbers = #tpu.dot_dimension_numbers<[1], [0], [0], [1], [0, 0, 1, 1], [], []>} : vector<16x16xf32>, vector<16x8xf32>, vector<16x8xf32> -> vector<16x8xf32>
    %c0_153 = arith.constant 0 : index
    %c0_154 = arith.constant 0 : index
    %176 = vector.load %arg22[%c0_153, %c0_154] : memref<1x8xf32, #tpu.memory_space<vmem>>, vector<1x8xf32>
    %177 = vector.broadcast %176 : vector<1x8xf32> to vector<16x8xf32>
    %178 = arith.addf %175, %177 : vector<16x8xf32>
    %c0_155 = arith.constant 0 : index
    %c0_156 = arith.constant 0 : index
    %179 = vector.load %arg23[%c0_155, %c0_156] : memref<16x8xf32, #tpu.memory_space<vmem>>, vector<16x8xf32>
    tpu.vector_store %arg23[%c0_155, %c0_156], %178 {strides = array<i32>} : memref<16x8xf32, #tpu.memory_space<vmem>>, vector<16x8xf32>,
    return
  }
}

</mosaic_0001>

<bundles_post_ra>
// kernel: pointnet_forward.1
= control target key start
LH: loop header
LB: loop body
LE: loop exit
PB: predicated region body
PF: predicated region fallthrough
CT: control target
= control target key end

     0   :  { %vm263_vm0 = vcmask 1043456   ;;  %vm256_vm1 = vcmask 31744   ;;  %v3975_v7 = vmov 0   ;;  %v74_v18 = vlaneseq  ;;  %s4615_s5 = inlined_call_operand.vmem [shape: f32[4,32], index: 5, kind: input, shape index: {}]   ;;  %s4616_s3 = inlined_call_operand.vmem [shape: f32[16,4], index: 3, kind: input, shape index: {}]   ;;  %s4617_s7 = inlined_call_operand.vmem [shape: f32[32,32], index: 7, kind: input, shape index: {}]   ;;  %s4618_s1 = inlined_call_operand.vmem [shape: s32[32,1], index: 1, kind: input, shape index: {}]   ;;  %s4619_s4 = inlined_call_operand.vmem [shape: f32[16,3], index: 4, kind: input, shape index: {}]   ;;  %s4620_s0 = inlined_call_operand.vmem [shape: s32[32,1], index: 0, kind: input, shape index: {}]   ;;  %s4621_s6 = inlined_call_operand.vmem [shape: f32[1,32], index: 6, kind: input, shape index: {}]   ;;  %s4622_s8 = inlined_call_operand.vmem [shape: f32[1,32], index: 8, kind: input, shape index: {}]   ;;  %s4623_s10 = inlined_call_operand.vmem [shape: f32[3,32,32], index: 10, kind: input, shape index: {}]   ;;  %s4624_s9 = inlined_call_operand.vmem [shape: f32[3,32,32], index: 9, kind: input, shape index: {}]   ;;  %s4625_s11 = inlined_call_operand.vmem [shape: f32[3,3,32], index: 11, kind: input, shape index: {}]   ;;  %s4626_s13 = inlined_call_operand.vmem [shape: f32[3,32,32], index: 13, kind: input, shape index: {}]   ;;  %s4627_s12 = inlined_call_operand.vmem [shape: f32[3,1,32], index: 12, kind: input, shape index: {}]   ;;  %s4628_s2 = inlined_call_operand.vmem [shape: s32[1,32], index: 2, kind: input, shape index: {}]   ;;  %s4629_s15 = inlined_call_operand.vmem [shape: f32[3,32,32], index: 15, kind: input, shape index: {}]   ;;  %s4630_s14 = inlined_call_operand.vmem [shape: f32[3,1,32], index: 14, kind: input, shape index: {}]   ;;  %s4631_s17 = inlined_call_operand.vmem [shape: f32[3,32,32], index: 17, kind: input, shape index: {}]   ;;  %s4632_s16 = inlined_call_operand.vmem [shape: f32[3,1,32], index: 16, kind: input, shape index: {}]   ;;  %s4633_s18 = inlined_call_operand.vmem [shape: f32[3,1,32], index: 18, kind: input, shape index: {}]   ;;  %s4634_s19 = inlined_call_operand.vmem [shape: f32[32,16], index: 19, kind: input, shape index: {}]   ;;  %s4635_s21 = inlined_call_operand.vmem [shape: f32[16,8], index: 21, kind: input, shape index: {}]   ;;  %s4636_s20 = inlined_call_operand.vmem [shape: f32[1,16], index: 20, kind: input, shape index: {}]   ;;  %s4637_s22 = inlined_call_operand.vmem [shape: f32[1,8], index: 22, kind: input, shape index: {}]   ;;  %s4638_s23 = inlined_call_operand.vmem [shape: f32[16,8], index: 23, kind: output, shape index: {}]  }
   0x1   :  { %4644 = sst [smem:[#allocation2_spill]] %s4615_s5  ;;  %3973 = vset.pattern.permute.xlu0 %v3975_v7  ;;  %3974 = vset.pattern.permute.xlu1 %v3975_v7  ;;  %vm355_vm2 = vcmask 261120   ;;  %vm148_vm3 = vcmask 130048   ;;  %v3976_v29 = vmov 0.0   ;;  %v626_v47 = vld [vmem:[%s4623_s10 + $0x18] sm:$0xff]  ;;  %v625_v50 = vld [vmem:[%s4623_s10 + $0x10] sm:$0xff] }
   0x2   :  { %4645 = sst [smem:[#allocation3_spill]] %s4616_s3  ;;  %v4152_v23 = vand.u32 127, %v74_v18  ;;  %v622_v48 = vld [vmem:[%s4624_s9 + $0x18] sm:$0xff]  ;;  %v621_v51 = vld [vmem:[%s4624_s9 + $0x10] sm:$0xff]  ;;  %v624_v53 = vld [vmem:[%s4623_s10 + $0x8] sm:$0xff]  ;;  %vm835_vm12 = vcmask 1042432  }
   0x3   :  { %4646 = sst [smem:[#allocation4_spill]] %s4617_s7  ;;  %v620_v54 = vld [vmem:[%s4624_s9 + $0x8] sm:$0xff]  ;;  %v623_v55 = vld [vmem:[%s4623_s10] sm:$0xff]  ;;  %vm822_vm13 = vcmask 23552   ;;  %v945_v7 = vld [vmem:[%s4626_s13 + $0x10] sm:$0xff] }
   0x4   :  { %4647 = sst [smem:[#allocation5_spill]] %s4618_s1  ;;  %v619_v56 = vld [vmem:[%s4624_s9] sm:$0xff] }
   0x5   :  { %4648 = sst [smem:[#allocation6_spill]] %s4619_s4  ;;  %v821_v57 = vld [vmem:[%s4625_s11] sm:$0x7] }
   0x6   :  { %4649 = sst [smem:[#allocation7_spill]] %s4620_s0 }
   0x7   :  { %4650 = sst [smem:[#allocation8_spill]] %s4621_s6 }
   0x8   :  { %4651 = sst [smem:[#allocation9_spill]] %s4622_s8 }
   0x9   :  { %s4652_s24 = sld [smem:[#allocation2_spill]] }
   0xa   :  { %s4653_s3 = sld [smem:[#allocation3_spill]] }
   0xb   :  { %s4654_s8 = sld [smem:[#allocation4_spill]] }
   0xc   :  { %s4655_s0 = sld [smem:[#allocation5_spill]] }
   0xd   :  { %s4656_s1 = sld [smem:[#allocation6_spill]] }
   0xe   :  { %s4657_s25 = sld [smem:[#allocation7_spill]] }
   0xf   :  { %v248_v0 = vld [vmem:[%s4652_s24] sm:$0xf]  ;;  %s4658_s29 = sld [smem:[#allocation8_spill]] }
  0x10   :  { %v246_v1 = vld [vmem:[%s4653_s3] sm:$0xff]  ;;  %v247_v2 = vld [vmem:[%s4653_s3 + $0x8] sm:$0xff]  ;;  %3628 = vmatprep.subr.msk.mxu1 %vm263_vm0, %v248_v0  ;;  %s4659_s4 = sld [smem:[#allocation9_spill]] }
  0x11   :  { %3630 = vmatprep.mubr.msk.f32.mxu1 %vm256_vm1, %v246_v1  ;;  %3629 = vmatpush3.msk.msra.mxu1 %vm263_vm0, %v248_v0  ;;  %v347_v3 = vld [vmem:[%s4654_s8 + $0x18] sm:$0xff]  ;;  %v346_v4 = vld [vmem:[%s4654_s8 + $0x10] sm:$0xff]  ;;  %v345_v5 = vld [vmem:[%s4654_s8 + $0x8] sm:$0xff]  ;;  %vm3226_vm0 = vcmask 64512  }
  0x12   :  { %3631 = vmatmul.mubr.msk.f32.vlgmr.msra.gmra.mxu1 %vm256_vm1, %v247_v2  ;;  %3633 = vmatprep.subr.mxu1 %v347_v3  ;;  %v344_v6 = vld [vmem:[%s4654_s8] sm:$0xff]  ;;  %v106_v9 = vld [vmem:[%s4655_s0 + $0x10] sm:$0xff]  ;;  %v105_v10 = vld [vmem:[%s4655_s0 + $0x8] sm:$0xff] }
  0x13   :  { %3634 = vmatpush3.msra.mxu1 %v347_v3  ;;  %v104_v8 = vld [vmem:[%s4655_s0] sm:$0xff]  ;;  %115 = vperm.xlu1 %3974, %v106_v9   ;;  %v107_v11 = vld [vmem:[%s4655_s0 + $0x18] sm:$0xff]  ;;  %v147_v12 = vld [vmem:[%s4656_s1 + $0x8] sm:$0xff] }
  0x14   :  { %3635 = vmatprep.subr.mxu1 %v346_v4  ;;  %109 = vperm.xlu0 %3973, %v104_v8   ;;  %v146_v13 = vld [vmem:[%s4656_s1] sm:$0xff]  ;;  %v77_v15 = vld [vmem:[%s4657_s25 + $0x8] sm:$0xff]  ;;  %v78_v16 = vld [vmem:[%s4657_s25 + $0x10] sm:$0xff] }
  0x15   :  { %3636 = vmatpush3.msra.mxu1 %v346_v4  ;;  %3618 = vmatprep.subr.mxu0 %v147_v12  ;;  %v76_v14 = vld [vmem:[%s4657_s25] sm:$0xff]  ;;  %v79_v17 = vld [vmem:[%s4657_s25 + $0x18] sm:$0xff]  ;;  %v944_v8 = vld [vmem:[%s4626_s13 + $0x8] sm:$0xff] }
  0x16   :  { %3637 = vmatprep.subr.mxu1 %v345_v5  ;;  %3619 = vmatpush3.msra.mxu0 %v147_v12  ;;  %v3248_v19 = vld [vmem:[%s4658_s29] ss:$0 sm:$0xff] }
  0x17   :  { %3638 = vmatpush3.msra.mxu1 %v345_v5  ;;  %118 = vperm.xlu1 %3974, %v107_v11   ;;  %v3252_v39 = vld [vmem:[%s4659_s4] ss:$0 sm:$0xff] }
  0x18   :  { %3639 = vmatprep.subr.mxu1 %v344_v6  ;;  %112 = vperm.xlu0 %3973, %v105_v10   ;;  %v943_v9 = vld [vmem:[%s4626_s13] sm:$0xff] }
  0x19   :  { %3640 = vmatpush3.msra.mxu1 %v344_v6  ;;  %3620 = vmatprep.subr.mxu0 %v146_v13  ;;  %v946_v6 = vld [vmem:[%s4626_s13 + $0x18] sm:$0xff] }
  0x1a   :  { %3621 = vmatpush3.msra.mxu0 %v146_v13 }
  0x1b   :  { %84 = vperm.xlu1 %3974, %v77_v15  }
  0x1c   :  { %81 = vperm.xlu0 %3973, %v76_v14  }
  0x1f   :  { %90 = vperm.xlu1 %3974, %v79_v17  }
  0x20   :  { %87 = vperm.xlu0 %3973, %v78_v16  }
  0x8e   :  { %v116_v27 = vpop.permute.xlu1 %115 }
  0x8f   :  { %v110_v26 = vpop.permute.xlu0 %109  ;;  %vm122_vm5 = vcmp.eq.s32.totalorder %v4152_v23, %v116_v27 }
  0x90   :  { %vm120_vm4 = vcmp.eq.s32.totalorder %v4152_v23, %v110_v26  ;;  %v4166_v33 = vsel %vm122_vm5, 1.0, %v3976_v29 }
  0x91   :  { %v4157_v30 = vsel %vm120_vm4, 1.0, %v3976_v29 }
  0x92   :  { %3622 = vmatprep.mubr.msk.f32.mxu0 %vm148_vm3, %v4157_v30  ;;  %v119_v32 = vpop.permute.xlu1 %118 }
  0x93   :  { %v113_v31 = vpop.permute.xlu0 %112  ;;  %vm123_vm7 = vcmp.eq.s32.totalorder %v4152_v23, %v119_v32 }
  0x94   :  { %vm121_vm6 = vcmp.eq.s32.totalorder %v4152_v23, %v113_v31  ;;  %v4176_v35 = vsel %vm123_vm7, 1.0, %v3976_v29 }
  0x95   :  { %v4171_v34 = vsel %vm121_vm6, 1.0, %v3976_v29 }
  0x96   :  { %3623 = vmatmul.mubr.msk.f32.vlgmr.msra.gmra.mxu0 %vm148_vm3, %v4171_v34  ;;  %v85_v38 = vpop.permute.xlu1 %84 }
  0x97   :  { %v82_v36 = vpop.permute.xlu0 %81  ;;  %3625 = vmatprep.mubr.msk.f32.mxu0 %vm148_vm3, %v4166_v33  ;;  %vm93_vm9 = vcmp.eq.s32.totalorder %v4152_v23, %v85_v38 }
  0x98   :  { %vm92_vm8 = vcmp.eq.s32.totalorder %v4152_v23, %v82_v36  ;;  %v4194_v46 = vsel %vm93_vm9, 1.0, %v3976_v29 }
  0x99   :  { %v4182_v37 = vsel %vm92_vm8, 1.0, %v3976_v29 }
  0x9a   :  { %3626 = vmatmul.mubr.msk.f32.gmra.mxu0 %vm148_vm3, %v4176_v35  ;;  %v91_v45 = vpop.permute.xlu1 %90 }
  0x9b   :  { %3648 = vmatprep.mubr.msk.f32.mxu0 %vm148_vm3, %v4182_v37  ;;  %v88_v41 = vpop.permute.xlu0 %87  ;;  %vm95_vm11 = vcmp.eq.s32.totalorder %v4152_v23, %v91_v45 }
  0x9c   :  { %vm94_vm10 = vcmp.eq.s32.totalorder %v4152_v23, %v88_v41  ;;  %v4221_v52 = vsel %vm95_vm11, 1.0, %v3976_v29 }
  0x9d   :  { %v4203_v49 = vsel %vm94_vm10, 1.0, %v3976_v29 }
  0xd2   :  { %v3632_v20 = vpop.f32.mrf.mxu1 }
  0xd3   :  { %v339_v21 = vadd.f32 %v3632_v20, %v3248_v19 }
  0xd4   :  { %v333_v22 = vpop.f32.mrf.mxu1 }
  0xd5   :  { %v334_v24 = vadd.f32 %v3248_v19, %v333_v22  ;;  %v343_v28 = vmax.f32 %v339_v21, 0.0  ;;  %v3276_v22 = vld [vmem:[%s4627_s12] ss:$0 sm:$0xff] }
  0xd7   :  { %v342_v25 = vmax.f32 %v334_v24, 0.0 }
  0xd9   :  { %3641 = vmatprep.mubr.msk.f32.mxu1 %vm355_vm2, %v342_v25 }
  0xda   :  { %3642 = vmatmul.mubr.msk.f32.vlgmr.msra.gmra.mxu1 %vm355_vm2, %v343_v28 }
  0xdb   :  { %3658 = vmatprep.mubr.msk.f32.mxu1 %vm148_vm3, %v4157_v30 }
 0x156   :  { %v4243_v58 = vpop.f32.mrf.mxu0 }
 0x158   :  { %v4245_v59 = vpop.f32.mrf.mxu0 }
 0x15a   :  { %v4247_v60 = vpop.f32.mrf.mxu0 }
 0x15c   :  { %v4249_v61 = vpop.f32.mrf.mxu0 }
 0x19a   :  { %v3643_v40 = vpop.f32.mrf.mxu1 }
 0x19b   :  { %v434_v42 = vadd.f32 %v3643_v40, %v3252_v39 }
 0x19c   :  { %v428_v43 = vpop.f32.mrf.mxu1 }
 0x19d   :  { %v429_v44 = vadd.f32 %v3252_v39, %v428_v43  ;;  %3644 = vmatprep.subr.mxu0 %v434_v42  ;;  %3654 = vmatprep.subr.mxu1 %v434_v42 }
 0x19e   :  { %3645 = vmatpush3.msra.mxu0 %v434_v42  ;;  %3655 = vmatpush3.msra.mxu1 %v434_v42 }
 0x19f   :  { %3646 = vmatprep.subr.mxu0 %v429_v44  ;;  %3656 = vmatprep.subr.mxu1 %v429_v44 }
 0x1a0   :  { %3647 = vmatpush3.msra.mxu0 %v429_v44  ;;  %3657 = vmatpush3.msra.mxu1 %v429_v44 }
 0x1a1   :  { %3649 = vmatmul.mubr.msk.f32.vlgmr.msra.gmra.mxu0 %vm148_vm3, %v4194_v46  ;;  %3659 = vmatmul.mubr.msk.f32.vlgmr.msra.gmra.mxu1 %vm148_vm3, %v4171_v34 }
 0x1a2   :  { %3651 = vmatprep.mubr.msk.f32.mxu0 %vm148_vm3, %v4203_v49  ;;  %3661 = vmatprep.mubr.msk.f32.mxu1 %vm148_vm3, %v4166_v33 }
 0x1a3   :  { %3664 = vmatprep.subr.mxu0 %v626_v47  ;;  %3678 = vmatprep.subr.mxu1 %v622_v48 }
 0x1a4   :  { %3665 = vmatpush3.msra.mxu0 %v626_v47  ;;  %3679 = vmatpush3.msra.mxu1 %v622_v48  ;;  %v133_v47 = vshrl.u32 %v74_v18, 7  ;;  %v1134_v18 = vld [vmem:[%s4629_s15 + $0x10] sm:$0xff] }
 0x1a5   :  { %3652 = vmatmul.mubr.msk.f32.gmra.mxu0 %vm148_vm3, %v4221_v52  ;;  %3662 = vmatmul.mubr.msk.f32.gmra.mxu1 %vm148_vm3, %v4176_v35 }
 0x1a6   :  { %3666 = vmatprep.subr.mxu0 %v625_v50  ;;  %3680 = vmatprep.subr.mxu1 %v621_v51  ;;  %v134_v48 = vadd.s32 8, %v133_v47 }
 0x1a7   :  { %3667 = vmatpush3.msra.mxu0 %v625_v50  ;;  %3681 = vmatpush3.msra.mxu1 %v621_v51  ;;  %v3241_v50 = vld [vmem:[%s4628_s2] ss:$0 sm:$0xff] }
 0x1a8   :  { %3668 = vmatprep.subr.mxu0 %v624_v53  ;;  %3682 = vmatprep.subr.mxu1 %v620_v54  ;;  %vm140_vm14 = vcmp.eq.s32.totalorder %v133_v47, %v3241_v50  ;;  %vm141_vm15 = vcmp.eq.s32.totalorder %v134_v48, %v3241_v50 }
 0x1a9   :  { %3669 = vmatpush3.msra.mxu0 %v624_v53  ;;  %3683 = vmatpush3.msra.mxu1 %v620_v54  ;;  %v4292_v51 = vsel %vm140_vm14, 1.0, %v3976_v29  ;;  %v1135_v53 = vld [vmem:[%s4629_s15 + $0x18] sm:$0xff] }
 0x1aa   :  { %3670 = vmatprep.subr.mxu0 %v623_v55  ;;  %3684 = vmatprep.subr.mxu1 %v619_v56 }
 0x1ab   :  { %3671 = vmatpush3.msra.mxu0 %v623_v55  ;;  %3685 = vmatpush3.msra.mxu1 %v619_v56  ;;  %v3277_v56 = vld [vmem:[%s4630_s14] ss:$0 sm:$0xff] }
 0x1ac   :  { %3692 = vmatprep.subr.msk.mxu0 %vm835_vm12, %v821_v57  ;;  %3700 = vmatprep.subr.mxu1 %v946_v6 }
 0x261   :  { %v3650_v62 = vpop.f32.mrf.mxu0  ;;  %v3660_v63 = vpop.f32.mrf.mxu1 }
 0x263   :  { %v515_v0 = vpop.f32.mrf.mxu0  ;;  %v600_v1 = vpop.f32.mrf.mxu1 }
 0x264   :  { %3672 = vmatprep.mubr.msk.f32.mxu0 %vm355_vm2, %v600_v1  ;;  %3686 = vmatprep.mubr.msk.f32.mxu1 %vm355_vm2, %v515_v0 }
 0x265   :  { %v3653_v2 = vpop.f32.mrf.mxu0  ;;  %v3663_v3 = vpop.f32.mrf.mxu1  ;;  %3673 = vmatmul.mubr.msk.f32.vlgmr.msra.gmra.mxu0 %vm355_vm2, %v3660_v63  ;;  %3687 = vmatmul.mubr.msk.f32.vlgmr.msra.gmra.mxu1 %vm355_vm2, %v3650_v62 }
 0x266   :  { %3693 = vmatpush3.msk.msra.mxu0 %vm835_vm12, %v821_v57  ;;  %3701 = vmatpush3.msra.mxu1 %v946_v6 }
 0x267   :  { %v525_v4 = vpop.f32.mrf.mxu0  ;;  %v610_v5 = vpop.f32.mrf.mxu1  ;;  %3702 = vmatprep.subr.mxu1 %v945_v7 }
 0x268   :  { %3675 = vmatprep.mubr.msk.f32.mxu0 %vm355_vm2, %v610_v5  ;;  %3689 = vmatprep.mubr.msk.f32.mxu1 %vm355_vm2, %v525_v4  ;;  %v1133_v4 = vld [vmem:[%s4629_s15 + $0x8] sm:$0xff]  ;;  %v1132_v5 = vld [vmem:[%s4629_s15] sm:$0xff] }
 0x269   :  { %3676 = vmatmul.mubr.msk.f32.gmra.mxu0 %vm355_vm2, %v3663_v3  ;;  %3690 = vmatmul.mubr.msk.f32.gmra.mxu1 %vm355_vm2, %v3653_v2  ;;  %v4307_v3 = vsel %vm141_vm15, 1.0, %v3976_v29 }
 0x26a   :  { %3694 = vmatprep.mubr.msk.f32.mxu0 %vm822_vm13, %v4245_v59  ;;  %3703 = vmatpush3.msra.mxu1 %v945_v7  ;;  %v1229_v7 = vld [vmem:[%s4631_s17 + $0x18] sm:$0xff] }
 0x26b   :  { %3704 = vmatprep.subr.mxu1 %v944_v8 }
 0x26c   :  { %3705 = vmatpush3.msra.mxu1 %v944_v8  ;;  %v1228_v8 = vld [vmem:[%s4631_s17 + $0x10] sm:$0xff] }
 0x26d   :  { %3695 = vmatmul.mubr.msk.f32.vlgmr.msra.gmra.mxu0 %vm822_vm13, %v4243_v58  ;;  %3706 = vmatprep.subr.mxu1 %v943_v9 }
 0x26e   :  { %3697 = vmatprep.mubr.msk.f32.mxu0 %vm822_vm13, %v4249_v61  ;;  %3707 = vmatpush3.msra.mxu1 %v943_v9  ;;  %v1227_v9 = vld [vmem:[%s4631_s17 + $0x8] sm:$0xff] }
 0x26f   :  { %3725 = vmatprep.subr.mxu1 %v1135_v53 }
 0x271   :  { %3698 = vmatmul.mubr.msk.f32.gmra.mxu0 %vm822_vm13, %v4247_v60 }
 0x272   :  { %3722 = vmatprep.mubr.msk.f32.mxu0 %vm355_vm2, %v4292_v51 }
 0x325   :  { %v3674_v10 = vpop.f32.mrf.mxu0  ;;  %v3688_v11 = vpop.f32.mrf.mxu1 }
 0x326   :  { %v808_v17 = vadd.f32 %v3688_v11, %v3674_v10  ;;  %v1226_v10 = vld [vmem:[%s4631_s17] sm:$0xff] }
 0x327   :  { %v705_v12 = vpop.f32.mrf.mxu0  ;;  %v802_v13 = vpop.f32.mrf.mxu1  ;;  %v3284_v11 = vld [vmem:[%s4632_s16] ss:$0 sm:$0xff] }
 0x328   :  { %v803_v20 = vadd.f32 %v802_v13, %v705_v12 }
 0x329   :  { %v3677_v14 = vpop.f32.mrf.mxu0  ;;  %v3691_v15 = vpop.f32.mrf.mxu1 }
 0x32a   :  { %v818_v25 = vadd.f32 %v3691_v15, %v3677_v14 }
 0x32b   :  { %v715_v16 = vpop.f32.mrf.mxu0  ;;  %v812_v23 = vpop.f32.mrf.mxu1 }
 0x32c   :  { %v813_v31 = vadd.f32 %v812_v23, %v715_v16 }
 0x32d   :  { %v3696_v19 = vpop.f32.mrf.mxu0 }
 0x32e   :  { %v925_v21 = vadd.f32 %v3696_v19, %v808_v17  ;;  %v3287_v19 = vld [vmem:[%s4633_s18] ss:$0 sm:$0xff] }
 0x32f   :  { %v905_v24 = vpop.f32.mrf.mxu0 }
 0x330   :  { %v924_v26 = vadd.f32 %v905_v24, %v803_v20  ;;  %v936_v27 = vadd.f32 %v3276_v22, %v925_v21 }
 0x331   :  { %v3699_v28 = vpop.f32.mrf.mxu0 }
 0x332   :  { %v935_v32 = vadd.f32 %v3276_v22, %v924_v26  ;;  %v927_v36 = vadd.f32 %v3699_v28, %v818_v25  ;;  %v940_v41 = vmax.f32 %v936_v27, 0.0  ;;  %v3305_v26 = vld [vmem:[%s4623_s10 + $0x38] sm:$0xff]  ;;  %v3304_v28 = vld [vmem:[%s4623_s10 + $0x30] sm:$0xff] }
 0x333   :  { %v915_v38 = vpop.f32.mrf.mxu0  ;;  %v3301_v27 = vld [vmem:[%s4624_s9 + $0x38] sm:$0xff] }
 0x334   :  { %v939_v39 = vmax.f32 %v935_v32, 0.0  ;;  %v926_v40 = vadd.f32 %v915_v38, %v813_v31  ;;  %v938_v42 = vadd.f32 %v3276_v22, %v927_v36  ;;  %v3300_v31 = vld [vmem:[%s4624_s9 + $0x30] sm:$0xff]  ;;  %v3303_v32 = vld [vmem:[%s4623_s10 + $0x28] sm:$0xff]  ;;  %v3302_v38 = vld [vmem:[%s4623_s10 + $0x20] sm:$0xff] }
 0x335   :  { %v3299_v36 = vld [vmem:[%s4624_s9 + $0x28] sm:$0xff] }
 0x336   :  { %v937_v43 = vadd.f32 %v3276_v22, %v926_v40  ;;  %3708 = vmatprep.mubr.msk.f32.mxu1 %vm355_vm2, %v939_v39  ;;  %v942_v45 = vmax.f32 %v938_v42, 0.0  ;;  %v3298_v39 = vld [vmem:[%s4624_s9 + $0x20] sm:$0xff] }
 0x337   :  { %3709 = vmatmul.mubr.msk.f32.vlgmr.msra.gmra.mxu1 %vm355_vm2, %v940_v41  ;;  %v3314_v40 = vld [vmem:[%s4625_s11 + $0x4] sm:$0x7] }
 0x338   :  { %v941_v44 = vmax.f32 %v937_v43, 0.0  ;;  %3726 = vmatpush3.msra.mxu1 %v1135_v53  ;;  %v3325_v53 = vld [vmem:[%s4626_s13 + $0x38] sm:$0xff] }
 0x339   :  { %3727 = vmatprep.subr.mxu1 %v1134_v18 }
 0x33a   :  { %3711 = vmatprep.mubr.msk.f32.mxu1 %vm355_vm2, %v941_v44  ;;  %3728 = vmatpush3.msra.mxu1 %v1134_v18  ;;  %v3324_v18 = vld [vmem:[%s4626_s13 + $0x30] sm:$0xff] }
 0x33b   :  { %3712 = vmatmul.mubr.msk.f32.gmra.mxu1 %vm355_vm2, %v942_v45  ;;  %3729 = vmatprep.subr.mxu1 %v1133_v4 }
 0x33c   :  { %3730 = vmatpush3.msra.mxu1 %v1133_v4 }
 0x33d   :  { %3731 = vmatprep.subr.mxu1 %v1132_v5 }
 0x33e   :  { %3732 = vmatpush3.msra.mxu1 %v1132_v5 }
 0x3f7   :  { %v3710_v54 = vpop.f32.mrf.mxu1 }
 0x3f8   :  { %v1038_v1 = vadd.f32 %v3710_v54, %v3277_v56  ;;  %v3323_v54 = vld [vmem:[%s4626_s13 + $0x28] sm:$0xff] }
 0x3f9   :  { %v1032_v55 = vpop.f32.mrf.mxu1 }
 0x3fa   :  { %v1033_v2 = vadd.f32 %v3277_v56, %v1032_v55  ;;  %v3322_v55 = vld [vmem:[%s4626_s13 + $0x20] sm:$0xff] }
 0x3fb   :  { %v3713_v57 = vpop.f32.mrf.mxu1 }
 0x3fc   :  { %v1048_v62 = vadd.f32 %v3713_v57, %v3277_v56 }
 0x3fd   :  { %v1042_v63 = vpop.f32.mrf.mxu1 }
 0x3fe   :  { %v1043_v0 = vadd.f32 %v3277_v56, %v1042_v63  ;;  %3714 = vmatprep.subr.mxu0 %v1048_v62 }
 0x3ff   :  { %3715 = vmatpush3.msra.mxu0 %v1048_v62 }
 0x400   :  { %3716 = vmatprep.subr.mxu0 %v1043_v0 }
 0x401   :  { %3717 = vmatpush3.msra.mxu0 %v1043_v0 }
 0x402   :  { %3718 = vmatprep.subr.mxu0 %v1038_v1 }
 0x403   :  { %3719 = vmatpush3.msra.mxu0 %v1038_v1 }
 0x404   :  { %3720 = vmatprep.subr.mxu0 %v1033_v2 }
 0x405   :  { %3721 = vmatpush3.msra.mxu0 %v1033_v2 }
 0x406   :  { %3723 = vmatmul.mubr.msk.f32.vlgmr.msra.gmra.mxu0 %vm355_vm2, %v4307_v3  ;;  %3736 = vmatprep.subr.mxu0 %v1229_v7 }
 0x407   :  { %3737 = vmatpush3.msra.mxu0 %v1229_v7  ;;  %v3321_v7 = vld [vmem:[%s4627_s12 + $0x1] ss:$0 sm:$0xff] }
 0x408   :  { %3738 = vmatprep.subr.mxu0 %v1228_v8 }
 0x409   :  { %3739 = vmatpush3.msra.mxu0 %v1228_v8 }
 0x40a   :  { %3740 = vmatprep.subr.mxu0 %v1227_v9 }
 0x40b   :  { %3741 = vmatpush3.msra.mxu0 %v1227_v9 }
 0x40c   :  { %3742 = vmatprep.subr.mxu0 %v1226_v10 }
 0x40d   :  { %3743 = vmatpush3.msra.mxu0 %v1226_v10 }
 0x4c6   :  { %v3724_v6 = vpop.f32.mrf.mxu0 }
 0x4c8   :  { %v1123_v29 = vpop.f32.mrf.mxu0 }
 0x4c9   :  { %3733 = vmatprep.mubr.msk.f32.mxu1 %vm355_vm2, %v1123_v29 }
 0x4ca   :  { %3734 = vmatmul.mubr.msk.f32.vlgmr.msra.gmra.mxu1 %vm355_vm2, %v3724_v6 }
 0x4cb   :  { %3751 = vmatprep.mubr.msk.f32.mxu1 %vm148_vm3, %v4182_v37 }
 0x58a   :  { %v3735_v12 = vpop.f32.mrf.mxu1 }
 0x58b   :  { %v1221_v13 = vadd.f32 %v3735_v12, %v3284_v11 }
 0x58c   :  { %v1215_v14 = vpop.f32.mrf.mxu1 }
 0x58d   :  { %v1216_v15 = vadd.f32 %v3284_v11, %v1215_v14  ;;  %v1225_v17 = vmax.f32 %v1221_v13, 0.0 }
 0x58f   :  { %v1224_v16 = vmax.f32 %v1216_v15, 0.0 }
 0x591   :  { %3744 = vmatprep.mubr.msk.f32.mxu0 %vm355_vm2, %v1224_v16 }
 0x592   :  { %3745 = vmatmul.mubr.msk.f32.vlgmr.msra.gmra.mxu0 %vm355_vm2, %v1225_v17 }
 0x593   :  { %3761 = vmatprep.mubr.msk.f32.mxu0 %vm148_vm3, %v4157_v30 }
 0x652   :  { %v3746_v20 = vpop.f32.mrf.mxu0 }
 0x653   :  { %v1315_v21 = vadd.f32 %v3746_v20, %v3287_v19 }
 0x654   :  { %v1309_v22 = vpop.f32.mrf.mxu0 }
 0x655   :  { %v1319_v23 = vmax.f32 %v1315_v21, 0.0  ;;  %v1310_v24 = vadd.f32 %v3287_v19, %v1309_v22 }
 0x657   :  { %v1318_v25 = vmax.f32 %v1310_v24, 0.0  ;;  %3747 = vmatprep.subr.mxu1 %v1319_v23  ;;  %3757 = vmatprep.subr.mxu0 %v1319_v23 }
 0x658   :  { %3748 = vmatpush3.msra.mxu1 %v1319_v23  ;;  %3758 = vmatpush3.msra.mxu0 %v1319_v23 }
 0x659   :  { %3749 = vmatprep.subr.mxu1 %v1318_v25  ;;  %3759 = vmatprep.subr.mxu0 %v1318_v25 }
 0x65a   :  { %3750 = vmatpush3.msra.mxu1 %v1318_v25  ;;  %3760 = vmatpush3.msra.mxu0 %v1318_v25 }
 0x65b   :  { %3752 = vmatmul.mubr.msk.f32.vlgmr.msra.gmra.mxu1 %vm148_vm3, %v4194_v46  ;;  %3762 = vmatmul.mubr.msk.f32.vlgmr.msra.gmra.mxu0 %vm148_vm3, %v4171_v34 }
 0x65c   :  { %3754 = vmatprep.mubr.msk.f32.mxu1 %vm148_vm3, %v4203_v49  ;;  %3764 = vmatprep.mubr.msk.f32.mxu0 %vm148_vm3, %v4166_v33 }
 0x65d   :  { %3767 = vmatprep.subr.mxu1 %v3305_v26  ;;  %3781 = vmatprep.subr.mxu0 %v3301_v27 }
 0x65e   :  { %3768 = vmatpush3.msra.mxu1 %v3305_v26  ;;  %3782 = vmatpush3.msra.mxu0 %v3301_v27  ;;  %v3337_v26 = vld [vmem:[%s4629_s15 + $0x38] sm:$0xff]  ;;  %v3336_v27 = vld [vmem:[%s4629_s15 + $0x30] sm:$0xff] }
 0x65f   :  { %3755 = vmatmul.mubr.msk.f32.gmra.mxu1 %vm148_vm3, %v4221_v52  ;;  %3765 = vmatmul.mubr.msk.f32.gmra.mxu0 %vm148_vm3, %v4176_v35 }
 0x660   :  { %3769 = vmatprep.subr.mxu1 %v3304_v28  ;;  %3783 = vmatprep.subr.mxu0 %v3300_v31 }
 0x661   :  { %3770 = vmatpush3.msra.mxu1 %v3304_v28  ;;  %3784 = vmatpush3.msra.mxu0 %v3300_v31 }
 0x662   :  { %3771 = vmatprep.subr.mxu1 %v3303_v32  ;;  %3785 = vmatprep.subr.mxu0 %v3299_v36 }
 0x663   :  { %3772 = vmatpush3.msra.mxu1 %v3303_v32  ;;  %3786 = vmatpush3.msra.mxu0 %v3299_v36  ;;  %v3327_v32 = vld [vmem:[%s4630_s14 + $0x1] ss:$0 sm:$0xff] }
 0x664   :  { %3773 = vmatprep.subr.mxu1 %v3302_v38  ;;  %3787 = vmatprep.subr.mxu0 %v3298_v39 }
 0x665   :  { %3774 = vmatpush3.msra.mxu1 %v3302_v38  ;;  %3788 = vmatpush3.msra.mxu0 %v3298_v39 }
 0x666   :  { %3795 = vmatprep.subr.msk.mxu1 %vm835_vm12, %v3314_v40  ;;  %3803 = vmatprep.subr.mxu0 %v3325_v53 }
 0x71b   :  { %v3753_v41 = vpop.f32.mrf.mxu1  ;;  %v3763_v42 = vpop.f32.mrf.mxu0 }
 0x71d   :  { %v1386_v43 = vpop.f32.mrf.mxu1  ;;  %v1471_v44 = vpop.f32.mrf.mxu0 }
 0x71e   :  { %3775 = vmatprep.mubr.msk.f32.mxu1 %vm355_vm2, %v1471_v44  ;;  %3789 = vmatprep.mubr.msk.f32.mxu0 %vm355_vm2, %v1386_v43  ;;  %v3335_v43 = vld [vmem:[%s4629_s15 + $0x28] sm:$0xff]  ;;  %v3334_v44 = vld [vmem:[%s4629_s15 + $0x20] sm:$0xff] }
 0x71f   :  { %v3756_v45 = vpop.f32.mrf.mxu1  ;;  %v3766_v47 = vpop.f32.mrf.mxu0  ;;  %3776 = vmatmul.mubr.msk.f32.vlgmr.msra.gmra.mxu1 %vm355_vm2, %v3763_v42  ;;  %3790 = vmatmul.mubr.msk.f32.vlgmr.msra.gmra.mxu0 %vm355_vm2, %v3753_v41 }
 0x720   :  { %3796 = vmatpush3.msk.msra.mxu1 %vm835_vm12, %v3314_v40  ;;  %3804 = vmatpush3.msra.mxu0 %v3325_v53  ;;  %v3343_v53 = vld [vmem:[%s4631_s17 + $0x28] sm:$0xff] }
 0x721   :  { %v1396_v48 = vpop.f32.mrf.mxu1  ;;  %v1481_v50 = vpop.f32.mrf.mxu0  ;;  %3805 = vmatprep.subr.mxu0 %v3324_v18 }
 0x722   :  { %3778 = vmatprep.mubr.msk.f32.mxu1 %vm355_vm2, %v1481_v50  ;;  %3792 = vmatprep.mubr.msk.f32.mxu0 %vm355_vm2, %v1396_v48  ;;  %v3345_v48 = vld [vmem:[%s4631_s17 + $0x38] sm:$0xff]  ;;  %v3344_v50 = vld [vmem:[%s4631_s17 + $0x30] sm:$0xff] }
 0x723   :  { %3779 = vmatmul.mubr.msk.f32.gmra.mxu1 %vm355_vm2, %v3766_v47  ;;  %3793 = vmatmul.mubr.msk.f32.gmra.mxu0 %vm355_vm2, %v3756_v45 }
 0x724   :  { %3797 = vmatprep.mubr.msk.f32.mxu1 %vm822_vm13, %v4245_v59  ;;  %3806 = vmatpush3.msra.mxu0 %v3324_v18  ;;  %v3339_v18 = vld [vmem:[%s4632_s16 + $0x1] ss:$0 sm:$0xff] }
 0x725   :  { %3807 = vmatprep.subr.mxu0 %v3323_v54 }
 0x726   :  { %3808 = vmatpush3.msra.mxu0 %v3323_v54 }
 0x727   :  { %3798 = vmatmul.mubr.msk.f32.vlgmr.msra.gmra.mxu1 %vm822_vm13, %v4243_v58  ;;  %3809 = vmatprep.subr.mxu0 %v3322_v55 }
 0x728   :  { %3800 = vmatprep.mubr.msk.f32.mxu1 %vm822_vm13, %v4249_v61  ;;  %3810 = vmatpush3.msra.mxu0 %v3322_v55 }
 0x729   :  { %3828 = vmatprep.subr.mxu0 %v3337_v26 }
 0x72b   :  { %3801 = vmatmul.mubr.msk.f32.gmra.mxu1 %vm822_vm13, %v4247_v60 }
 0x72c   :  { %3825 = vmatprep.mubr.msk.f32.mxu1 %vm355_vm2, %v4292_v51 }
 0x7df   :  { %v3777_v56 = vpop.f32.mrf.mxu1  ;;  %v3791_v57 = vpop.f32.mrf.mxu0 }
 0x7e0   :  { %v1681_v4 = vadd.f32 %v3791_v57, %v3777_v56 }
 0x7e1   :  { %v1578_v62 = vpop.f32.mrf.mxu1  ;;  %v1675_v63 = vpop.f32.mrf.mxu0 }
 0x7e2   :  { %v1676_v6 = vadd.f32 %v1675_v63, %v1578_v62 }
 0x7e3   :  { %v3780_v0 = vpop.f32.mrf.mxu1  ;;  %v3794_v1 = vpop.f32.mrf.mxu0 }
 0x7e4   :  { %v1691_v10 = vadd.f32 %v3794_v1, %v3780_v0  ;;  %v3347_v0 = vld [vmem:[%s4633_s18 + $0x1] ss:$0 sm:$0xff] }
 0x7e5   :  { %v1588_v2 = vpop.f32.mrf.mxu1  ;;  %v1685_v8 = vpop.f32.mrf.mxu0 }
 0x7e6   :  { %v1686_v14 = vadd.f32 %v1685_v8, %v1588_v2  ;;  %v3364_v8 = vld [vmem:[%s4623_s10 + $0x50] sm:$0xff] }
 0x7e7   :  { %v3799_v5 = vpop.f32.mrf.mxu1 }
 0x7e8   :  { %v1785_v29 = vadd.f32 %v3799_v5, %v1681_v4 }
 0x7e9   :  { %v1765_v9 = vpop.f32.mrf.mxu1 }
 0x7ea   :  { %v1784_v11 = vadd.f32 %v1765_v9, %v1676_v6  ;;  %v1797_v12 = vadd.f32 %v3321_v7, %v1785_v29  ;;  %v3360_v9 = vld [vmem:[%s4624_s9 + $0x50] sm:$0xff] }
 0x7eb   :  { %v3802_v13 = vpop.f32.mrf.mxu1 }
 0x7ec   :  { %v1796_v15 = vadd.f32 %v3321_v7, %v1784_v11  ;;  %v1787_v16 = vadd.f32 %v3802_v13, %v1691_v10  ;;  %v1801_v21 = vmax.f32 %v1797_v12, 0.0 }
 0x7ed   :  { %v1775_v17 = vpop.f32.mrf.mxu1 }
 0x7ee   :  { %v1800_v19 = vmax.f32 %v1796_v15, 0.0  ;;  %v1786_v20 = vadd.f32 %v1775_v17, %v1686_v14  ;;  %v1799_v22 = vadd.f32 %v3321_v7, %v1787_v16  ;;  %v3385_v17 = vld [vmem:[%s4626_s13 + $0x58] sm:$0xff] }
 0x7f0   :  { %v1798_v23 = vadd.f32 %v3321_v7, %v1786_v20  ;;  %3811 = vmatprep.mubr.msk.f32.mxu0 %vm355_vm2, %v1800_v19  ;;  %v1803_v25 = vmax.f32 %v1799_v22, 0.0  ;;  %v3361_v7 = vld [vmem:[%s4624_s9 + $0x58] sm:$0xff] }
 0x7f1   :  { %3812 = vmatmul.mubr.msk.f32.vlgmr.msra.gmra.mxu0 %vm355_vm2, %v1801_v21 }
 0x7f2   :  { %v1802_v24 = vmax.f32 %v1798_v23, 0.0  ;;  %3829 = vmatpush3.msra.mxu0 %v3337_v26 }
 0x7f3   :  { %3830 = vmatprep.subr.mxu0 %v3336_v27 }
 0x7f4   :  { %3814 = vmatprep.mubr.msk.f32.mxu0 %vm355_vm2, %v1802_v24  ;;  %3831 = vmatpush3.msra.mxu0 %v3336_v27 }
 0x7f5   :  { %3815 = vmatmul.mubr.msk.f32.gmra.mxu0 %vm355_vm2, %v1803_v25  ;;  %3832 = vmatprep.subr.mxu0 %v3335_v43 }
 0x7f6   :  { %3833 = vmatpush3.msra.mxu0 %v3335_v43 }
 0x7f7   :  { %3834 = vmatprep.subr.mxu0 %v3334_v44 }
 0x7f8   :  { %3835 = vmatpush3.msra.mxu0 %v3334_v44 }
 0x8b1   :  { %v3813_v28 = vpop.f32.mrf.mxu0 }
 0x8b2   :  { %v1901_v41 = vadd.f32 %v3813_v28, %v3327_v32  ;;  %v3381_v28 = vld [vmem:[%s4627_s12 + $0x2] ss:$0 sm:$0xff] }
 0x8b3   :  { %v1895_v31 = vpop.f32.mrf.mxu0 }
 0x8b4   :  { %v1896_v42 = vadd.f32 %v3327_v32, %v1895_v31 }
 0x8b5   :  { %v3816_v36 = vpop.f32.mrf.mxu0 }
 0x8b6   :  { %v1911_v38 = vadd.f32 %v3816_v36, %v3327_v32 }
 0x8b7   :  { %v1905_v39 = vpop.f32.mrf.mxu0 }
 0x8b8   :  { %v1906_v40 = vadd.f32 %v3327_v32, %v1905_v39  ;;  %3817 = vmatprep.subr.mxu1 %v1911_v38 }
 0x8b9   :  { %3818 = vmatpush3.msra.mxu1 %v1911_v38 }
 0x8ba   :  { %3819 = vmatprep.subr.mxu1 %v1906_v40 }
 0x8bb   :  { %3820 = vmatpush3.msra.mxu1 %v1906_v40 }
 0x8bc   :  { %3821 = vmatprep.subr.mxu1 %v1901_v41 }
 0x8bd   :  { %3822 = vmatpush3.msra.mxu1 %v1901_v41 }
 0x8be   :  { %3823 = vmatprep.subr.mxu1 %v1896_v42 }
 0x8bf   :  { %3824 = vmatpush3.msra.mxu1 %v1896_v42 }
 0x8c0   :  { %3826 = vmatmul.mubr.msk.f32.vlgmr.msra.gmra.mxu1 %vm355_vm2, %v4307_v3  ;;  %3839 = vmatprep.subr.mxu1 %v3345_v48 }
 0x8c1   :  { %3840 = vmatpush3.msra.mxu1 %v3345_v48 }
 0x8c2   :  { %3841 = vmatprep.subr.mxu1 %v3344_v50 }
 0x8c3   :  { %3842 = vmatpush3.msra.mxu1 %v3344_v50 }
 0x8c4   :  { %3843 = vmatprep.subr.mxu1 %v3343_v53 }
 0x8c5   :  { %3844 = vmatpush3.msra.mxu1 %v3343_v53 }
 0x980   :  { %v3827_v45 = vpop.f32.mrf.mxu1 }
 0x982   :  { %v1980_v47 = vpop.f32.mrf.mxu1 }
 0x983   :  { %3836 = vmatprep.mubr.msk.f32.mxu0 %vm355_vm2, %v1980_v47 }
 0x984   :  { %3837 = vmatmul.mubr.msk.f32.vlgmr.msra.gmra.mxu0 %vm355_vm2, %v3827_v45 }
 0x985   :  { %3854 = vmatprep.mubr.msk.f32.mxu0 %vm148_vm3, %v4182_v37  ;;  %v3342_v37 = vld [vmem:[%s4631_s17 + $0x20] sm:$0xff] }
 0x986   :  { %3845 = vmatprep.subr.mxu1 %v3342_v37 }
 0x987   :  { %3846 = vmatpush3.msra.mxu1 %v3342_v37 }
 0xa44   :  { %v3838_v54 = vpop.f32.mrf.mxu0 }
 0xa45   :  { %v2080_v55 = vadd.f32 %v3838_v54, %v3339_v18  ;;  %v3397_v54 = vld [vmem:[%s4629_s15 + $0x58] sm:$0xff] }
 0xa46   :  { %v2074_v56 = vpop.f32.mrf.mxu0 }
 0xa47   :  { %v2075_v57 = vadd.f32 %v3339_v18, %v2074_v56  ;;  %v2084_v63 = vmax.f32 %v2080_v55, 0.0  ;;  %v3396_v55 = vld [vmem:[%s4629_s15 + $0x50] sm:$0xff] }
 0xa49   :  { %v2083_v62 = vmax.f32 %v2075_v57, 0.0 }
 0xa4b   :  { %3847 = vmatprep.mubr.msk.f32.mxu1 %vm355_vm2, %v2083_v62  ;;  %v3387_v62 = vld [vmem:[%s4630_s14 + $0x2] ss:$0 sm:$0xff] }
 0xa4c   :  { %3848 = vmatmul.mubr.msk.f32.vlgmr.msra.gmra.mxu1 %vm355_vm2, %v2084_v63 }
 0xa4d   :  { %3864 = vmatprep.mubr.msk.f32.mxu1 %vm148_vm3, %v4157_v30  ;;  %v3365_v30 = vld [vmem:[%s4623_s10 + $0x58] sm:$0xff] }
 0xb0c   :  { %v3849_v1 = vpop.f32.mrf.mxu1 }
 0xb0d   :  { %v2176_v2 = vadd.f32 %v3849_v1, %v3347_v0 }
 0xb0e   :  { %v2170_v4 = vpop.f32.mrf.mxu1 }
 0xb0f   :  { %v2180_v5 = vmax.f32 %v2176_v2, 0.0  ;;  %v2171_v6 = vadd.f32 %v3347_v0, %v2170_v4 }
 0xb11   :  { %v2179_v29 = vmax.f32 %v2171_v6, 0.0  ;;  %3850 = vmatprep.subr.mxu0 %v2180_v5  ;;  %3860 = vmatprep.subr.mxu1 %v2180_v5  ;;  %v3395_v6 = vld [vmem:[%s4629_s15 + $0x48] sm:$0xff] }
 0xb12   :  { %3851 = vmatpush3.msra.mxu0 %v2180_v5  ;;  %3861 = vmatpush3.msra.mxu1 %v2180_v5 }
 0xb13   :  { %3852 = vmatprep.subr.mxu0 %v2179_v29  ;;  %3862 = vmatprep.subr.mxu1 %v2179_v29 }
 0xb14   :  { %3853 = vmatpush3.msra.mxu0 %v2179_v29  ;;  %3863 = vmatpush3.msra.mxu1 %v2179_v29  ;;  %v3394_v29 = vld [vmem:[%s4629_s15 + $0x40] sm:$0xff] }
 0xb15   :  { %3855 = vmatmul.mubr.msk.f32.vlgmr.msra.gmra.mxu0 %vm148_vm3, %v4194_v46  ;;  %3865 = vmatmul.mubr.msk.f32.vlgmr.msra.gmra.mxu1 %vm148_vm3, %v4171_v34  ;;  %v3359_v34 = vld [vmem:[%s4624_s9 + $0x48] sm:$0xff]  ;;  %v3358_v46 = vld [vmem:[%s4624_s9 + $0x40] sm:$0xff] }
 0xb16   :  { %3857 = vmatprep.mubr.msk.f32.mxu0 %vm148_vm3, %v4203_v49  ;;  %3867 = vmatprep.mubr.msk.f32.mxu1 %vm148_vm3, %v4166_v33  ;;  %v3363_v33 = vld [vmem:[%s4623_s10 + $0x48] sm:$0xff] }
 0xb17   :  { %3870 = vmatprep.subr.mxu0 %v3365_v30  ;;  %3884 = vmatprep.subr.mxu1 %v3361_v7  ;;  %v3374_v49 = vld [vmem:[%s4625_s11 + $0x8] sm:$0x7] }
 0xb18   :  { %3871 = vmatpush3.msra.mxu0 %v3365_v30  ;;  %3885 = vmatpush3.msra.mxu1 %v3361_v7 }
 0xb19   :  { %3858 = vmatmul.mubr.msk.f32.gmra.mxu0 %vm148_vm3, %v4221_v52  ;;  %3868 = vmatmul.mubr.msk.f32.gmra.mxu1 %vm148_vm3, %v4176_v35  ;;  %v3362_v35 = vld [vmem:[%s4623_s10 + $0x40] sm:$0xff] }
 0xb1a   :  { %3872 = vmatprep.subr.mxu0 %v3364_v8  ;;  %3886 = vmatprep.subr.mxu1 %v3360_v9 }
 0xb1b   :  { %3873 = vmatpush3.msra.mxu0 %v3364_v8  ;;  %3887 = vmatpush3.msra.mxu1 %v3360_v9  ;;  %v3404_v8 = vld [vmem:[%s4631_s17 + $0x50] sm:$0xff]  ;;  %v3403_v9 = vld [vmem:[%s4631_s17 + $0x48] sm:$0xff] }
 0xb1c   :  { %3874 = vmatprep.subr.mxu0 %v3363_v33  ;;  %3888 = vmatprep.subr.mxu1 %v3359_v34 }
 0xb1d   :  { %3875 = vmatpush3.msra.mxu0 %v3363_v33  ;;  %3889 = vmatpush3.msra.mxu1 %v3359_v34  ;;  %v3402_v33 = vld [vmem:[%s4631_s17 + $0x40] sm:$0xff] }
 0xb1e   :  { %3876 = vmatprep.subr.mxu0 %v3362_v35  ;;  %3890 = vmatprep.subr.mxu1 %v3358_v46  ;;  %v3399_v34 = vld [vmem:[%s4632_s16 + $0x2] ss:$0 sm:$0xff] }
 0xb1f   :  { %3877 = vmatpush3.msra.mxu0 %v3362_v35  ;;  %3891 = vmatpush3.msra.mxu1 %v3358_v46 }
 0xb20   :  { %3898 = vmatprep.subr.msk.mxu0 %vm835_vm12, %v3374_v49  ;;  %3906 = vmatprep.subr.mxu1 %v3385_v17 }
 0xbd5   :  { %v3856_v52 = vpop.f32.mrf.mxu0  ;;  %v3866_v10 = vpop.f32.mrf.mxu1 }
 0xbd7   :  { %v2247_v11 = vpop.f32.mrf.mxu0  ;;  %v2332_v12 = vpop.f32.mrf.mxu1 }
 0xbd8   :  { %3878 = vmatprep.mubr.msk.f32.mxu0 %vm355_vm2, %v2332_v12  ;;  %3892 = vmatprep.mubr.msk.f32.mxu1 %vm355_vm2, %v2247_v11  ;;  %v3045_v12 = vld [vmem:[%s4634_s19 + $0x18] sm:$0xff] }
 0xbd9   :  { %v3859_v13 = vpop.f32.mrf.mxu0  ;;  %v3869_v14 = vpop.f32.mrf.mxu1  ;;  %3879 = vmatmul.mubr.msk.f32.vlgmr.msra.gmra.mxu0 %vm355_vm2, %v3866_v10  ;;  %3893 = vmatmul.mubr.msk.f32.vlgmr.msra.gmra.mxu1 %vm355_vm2, %v3856_v52 }
 0xbda   :  { %3899 = vmatpush3.msk.msra.mxu0 %vm835_vm12, %v3374_v49  ;;  %3907 = vmatpush3.msra.mxu1 %v3385_v17 }
 0xbdb   :  { %v2257_v15 = vpop.f32.mrf.mxu0  ;;  %v2342_v16 = vpop.f32.mrf.mxu1 }
 0xbdc   :  { %3881 = vmatprep.mubr.msk.f32.mxu0 %vm355_vm2, %v2342_v16  ;;  %3895 = vmatprep.mubr.msk.f32.mxu1 %vm355_vm2, %v2257_v15  ;;  %v3042_v15 = vld [vmem:[%s4634_s19] sm:$0xff] }
 0xbdd   :  { %3882 = vmatmul.mubr.msk.f32.gmra.mxu0 %vm355_vm2, %v3869_v14  ;;  %3896 = vmatmul.mubr.msk.f32.gmra.mxu1 %vm355_vm2, %v3859_v13  ;;  %v3044_v13 = vld [vmem:[%s4634_s19 + $0x10] sm:$0xff]  ;;  %v3043_v14 = vld [vmem:[%s4634_s19 + $0x8] sm:$0xff]  ;;  %v3407_v16 = vld [vmem:[%s4633_s18 + $0x2] ss:$0 sm:$0xff] }
 0xbde   :  { %3900 = vmatprep.mubr.msk.f32.mxu0 %vm822_vm13, %v4245_v59  ;;  %v3384_v59 = vld [vmem:[%s4626_s13 + $0x50] sm:$0xff] }
 0xbdf   :  { %3908 = vmatprep.subr.mxu1 %v3384_v59 }
 0xbe0   :  { %3909 = vmatpush3.msra.mxu1 %v3384_v59 }
 0xbe1   :  { %3901 = vmatmul.mubr.msk.f32.vlgmr.msra.gmra.mxu0 %vm822_vm13, %v4243_v58  ;;  %v3383_v58 = vld [vmem:[%s4626_s13 + $0x48] sm:$0xff] }
 0xbe2   :  { %3903 = vmatprep.mubr.msk.f32.mxu0 %vm822_vm13, %v4249_v61  ;;  %3910 = vmatprep.subr.mxu1 %v3383_v58 }
 0xbe3   :  { %3911 = vmatpush3.msra.mxu1 %v3383_v58 }
 0xbe5   :  { %3904 = vmatmul.mubr.msk.f32.gmra.mxu0 %vm822_vm13, %v4247_v60  ;;  %v3382_v60 = vld [vmem:[%s4626_s13 + $0x40] sm:$0xff] }
 0xbe6   :  { %3928 = vmatprep.mubr.msk.f32.mxu0 %vm355_vm2, %v4292_v51  ;;  %3912 = vmatprep.subr.mxu1 %v3382_v60 }
 0xbe7   :  { %3913 = vmatpush3.msra.mxu1 %v3382_v60 }
 0xbe8   :  { %3931 = vmatprep.subr.mxu1 %v3397_v54 }
 0xc99   :  { %v3880_v61 = vpop.f32.mrf.mxu0  ;;  %v3894_v51 = vpop.f32.mrf.mxu1 }
 0xc9a   :  { %v2542_v24 = vadd.f32 %v3894_v51, %v3880_v61 }
 0xc9b   :  { %v2439_v19 = vpop.f32.mrf.mxu0  ;;  %v2536_v20 = vpop.f32.mrf.mxu1 }
 0xc9c   :  { %v2537_v26 = vadd.f32 %v2536_v20, %v2439_v19  ;;  %v3137_v19 = vld [vmem:[%s4635_s21 + $0x8] sm:$0xff]  ;;  %v3136_v20 = vld [vmem:[%s4635_s21] sm:$0xff] }
 0xc9d   :  { %v3883_v21 = vpop.f32.mrf.mxu0  ;;  %v3897_v22 = vpop.f32.mrf.mxu1 }
 0xc9e   :  { %v2552_v36 = vadd.f32 %v3897_v22, %v3883_v21  ;;  %v3410_v21 = vld [vmem:[%s4636_s20] ss:$0 sm:$0xff] }
 0xc9f   :  { %v2449_v23 = vpop.f32.mrf.mxu0  ;;  %v2546_v31 = vpop.f32.mrf.mxu1 }
 0xca0   :  { %v2547_v41 = vadd.f32 %v2546_v31, %v2449_v23 }
 0xca1   :  { %v3902_v25 = vpop.f32.mrf.mxu0 }
 0xca2   :  { %v2646_v27 = vadd.f32 %v3902_v25, %v2542_v24 }
 0xca3   :  { %v2626_v32 = vpop.f32.mrf.mxu0 }
 0xca4   :  { %v2645_v38 = vadd.f32 %v2626_v32, %v2537_v26  ;;  %v2658_v39 = vadd.f32 %v3381_v28, %v2646_v27 }
 0xca5   :  { %v3905_v40 = vpop.f32.mrf.mxu0 }
 0xca6   :  { %v2657_v42 = vadd.f32 %v3381_v28, %v2645_v38  ;;  %v2648_v43 = vadd.f32 %v3905_v40, %v2552_v36  ;;  %v2662_v48 = vmax.f32 %v2658_v39, 0.0 }
 0xca7   :  { %v2636_v44 = vpop.f32.mrf.mxu0 }
 0xca8   :  { %v2661_v45 = vmax.f32 %v2657_v42, 0.0  ;;  %v2647_v47 = vadd.f32 %v2636_v44, %v2547_v41  ;;  %v2660_v50 = vadd.f32 %v3381_v28, %v2648_v43 }
 0xcaa   :  { %v2659_v53 = vadd.f32 %v3381_v28, %v2647_v47  ;;  %3914 = vmatprep.mubr.msk.f32.mxu1 %vm355_vm2, %v2661_v45  ;;  %v2664_v18 = vmax.f32 %v2660_v50, 0.0  ;;  %v3413_v28 = vld [vmem:[%s4637_s22] ss:$0 sm:$0xff] }
 0xcab   :  { %3915 = vmatmul.mubr.msk.f32.vlgmr.msra.gmra.mxu1 %vm355_vm2, %v2662_v48 }
 0xcac   :  { %v2663_v37 = vmax.f32 %v2659_v53, 0.0  ;;  %3932 = vmatpush3.msra.mxu1 %v3397_v54 }
 0xcad   :  { %3933 = vmatprep.subr.mxu1 %v3396_v55 }
 0xcae   :  { %3917 = vmatprep.mubr.msk.f32.mxu1 %vm355_vm2, %v2663_v37  ;;  %3934 = vmatpush3.msra.mxu1 %v3396_v55 }
 0xcaf   :  { %3918 = vmatmul.mubr.msk.f32.gmra.mxu1 %vm355_vm2, %v2664_v18  ;;  %3935 = vmatprep.subr.mxu1 %v3395_v6 }
 0xcb0   :  { %3936 = vmatpush3.msra.mxu1 %v3395_v6 }
 0xcb1   :  { %3937 = vmatprep.subr.mxu1 %v3394_v29 }
 0xcb2   :  { %3938 = vmatpush3.msra.mxu1 %v3394_v29 }
 0xcb3   :  { %3953 = vmatprep.subr.mxu1 %v3045_v12 }
 0xd6b   :  { %v3916_v56 = vpop.f32.mrf.mxu1 }
 0xd6c   :  { %v2762_v4 = vadd.f32 %v3916_v56, %v3387_v62 }
 0xd6d   :  { %v2756_v57 = vpop.f32.mrf.mxu1 }
 0xd6e   :  { %v2757_v5 = vadd.f32 %v3387_v62, %v2756_v57 }
 0xd6f   :  { %v3919_v63 = vpop.f32.mrf.mxu1 }
 0xd70   :  { %v2772_v0 = vadd.f32 %v3919_v63, %v3387_v62 }
 0xd71   :  { %v2766_v1 = vpop.f32.mrf.mxu1 }
 0xd72   :  { %v2767_v2 = vadd.f32 %v3387_v62, %v2766_v1  ;;  %3920 = vmatprep.subr.mxu0 %v2772_v0 }
 0xd73   :  { %3921 = vmatpush3.msra.mxu0 %v2772_v0 }
 0xd74   :  { %3922 = vmatprep.subr.mxu0 %v2767_v2 }
 0xd75   :  { %3923 = vmatpush3.msra.mxu0 %v2767_v2 }
 0xd76   :  { %3924 = vmatprep.subr.mxu0 %v2762_v4 }
 0xd77   :  { %3925 = vmatpush3.msra.mxu0 %v2762_v4 }
 0xd78   :  { %3926 = vmatprep.subr.mxu0 %v2757_v5 }
 0xd79   :  { %3927 = vmatpush3.msra.mxu0 %v2757_v5 }
 0xd7a   :  { %3929 = vmatmul.mubr.msk.f32.vlgmr.msra.gmra.mxu0 %vm355_vm2, %v4307_v3  ;;  %v3405_v3 = vld [vmem:[%s4631_s17 + $0x58] sm:$0xff] }
 0xd7b   :  { %3942 = vmatprep.subr.mxu0 %v3405_v3 }
 0xd7c   :  { %3943 = vmatpush3.msra.mxu0 %v3405_v3 }
 0xd7d   :  { %3944 = vmatprep.subr.mxu0 %v3404_v8 }
 0xd7e   :  { %3945 = vmatpush3.msra.mxu0 %v3404_v8 }
 0xd7f   :  { %3946 = vmatprep.subr.mxu0 %v3403_v9 }
 0xd80   :  { %3947 = vmatpush3.msra.mxu0 %v3403_v9 }
 0xd81   :  { %3948 = vmatprep.subr.mxu0 %v3402_v33 }
 0xd82   :  { %3949 = vmatpush3.msra.mxu0 %v3402_v33 }
 0xd83   :  { %3964 = vmatprep.subr.mxu0 %v3137_v19 }
 0xe3a   :  { %v3930_v30 = vpop.f32.mrf.mxu0 }
 0xe3c   :  { %v2841_v7 = vpop.f32.mrf.mxu0 }
 0xe3d   :  { %3939 = vmatprep.mubr.msk.f32.mxu1 %vm355_vm2, %v2841_v7 }
 0xe3e   :  { %3940 = vmatmul.mubr.msk.f32.vlgmr.msra.gmra.mxu1 %vm355_vm2, %v3930_v30 }
 0xe3f   :  { %3954 = vmatpush3.msra.mxu1 %v3045_v12 }
 0xe40   :  { %3955 = vmatprep.subr.mxu1 %v3044_v13 }
 0xe41   :  { %3956 = vmatpush3.msra.mxu1 %v3044_v13 }
 0xe42   :  { %3957 = vmatprep.subr.mxu1 %v3043_v14 }
 0xe43   :  { %3958 = vmatpush3.msra.mxu1 %v3043_v14 }
 0xe44   :  { %3959 = vmatprep.subr.mxu1 %v3042_v15 }
 0xe45   :  { %3960 = vmatpush3.msra.mxu1 %v3042_v15 }
 0xefe   :  { %v3941_v35 = vpop.f32.mrf.mxu1 }
 0xeff   :  { %v2941_v46 = vadd.f32 %v3941_v35, %v3399_v34 }
 0xf00   :  { %v2935_v49 = vpop.f32.mrf.mxu1 }
 0xf01   :  { %v2936_v52 = vadd.f32 %v3399_v34, %v2935_v49  ;;  %v2945_v11 = vmax.f32 %v2941_v46, 0.0 }
 0xf03   :  { %v2944_v10 = vmax.f32 %v2936_v52, 0.0 }
 0xf05   :  { %3950 = vmatprep.mubr.msk.f32.mxu0 %vm355_vm2, %v2944_v10 }
 0xf06   :  { %3951 = vmatmul.mubr.msk.f32.vlgmr.msra.gmra.mxu0 %vm355_vm2, %v2945_v11 }
 0xf07   :  { %3965 = vmatpush3.msra.mxu0 %v3137_v19 }
 0xf08   :  { %3966 = vmatprep.subr.mxu0 %v3136_v20 }
 0xf09   :  { %3967 = vmatpush3.msra.mxu0 %v3136_v20 }
 0xfc6   :  { %v3952_v17 = vpop.f32.mrf.mxu0 }
 0xfc7   :  { %v3037_v59 = vadd.f32 %v3952_v17, %v3407_v16 }
 0xfc8   :  { %v3031_v58 = vpop.f32.mrf.mxu0 }
 0xfc9   :  { %v3032_v60 = vadd.f32 %v3407_v16, %v3031_v58  ;;  %v3041_v51 = vmax.f32 %v3037_v59, 0.0 }
 0xfcb   :  { %v3040_v61 = vmax.f32 %v3032_v60, 0.0 }
 0xfcd   :  { %3961 = vmatprep.mubr.msk.f32.mxu1 %vm355_vm2, %v3040_v61 }
 0xfce   :  { %3962 = vmatmul.mubr.msk.f32.vlgmr.msra.gmra.mxu1 %vm355_vm2, %v3041_v51 }
0x108e   :  { %v3963_v22 = vpop.f32.mrf.mxu1 }
0x108f   :  { %v3131_v23 = vadd.f32 %v3963_v22, %v3410_v21 }
0x1090   :  { %v3125_v24 = vpop.f32.mrf.mxu1 }
0x1091   :  { %v3126_v25 = vadd.f32 %v3410_v21, %v3125_v24  ;;  %v3135_v27 = vmax.f32 %v3131_v23, 0.0 }
0x1093   :  { %v3134_v26 = vmax.f32 %v3126_v25, 0.0 }
0x1095   :  { %3968 = vmatprep.mubr.msk.f32.mxu0 %vm148_vm3, %v3134_v26 }
0x1096   :  { %3969 = vmatmul.mubr.msk.f32.vlgmr.msra.gmra.mxu0 %vm148_vm3, %v3135_v27 }
0x1156   :  { %v3970_v31 = vpop.f32.mrf.mxu0 }
0x1157   :  { %v3223_v32 = vadd.f32 %v3970_v31, %v3413_v28 }
0x1158   :  { %v3217_v36 = vpop.f32.mrf.mxu0 }
0x1159   :  { %3228 = vst.msk [vmem:[%s4638_s23 + $0x8] sm:$0xff] %vm3226_vm0, %v3223_v32  ;;  %v3218_v38 = vadd.f32 %v3413_v28, %v3217_v36 }
0x115b   :  { %3227 = vst.msk [vmem:[%s4638_s23] sm:$0xff] %vm3226_vm0, %v3218_v38 }

</bundles_post_ra>
